<compile_context>
chip_gen: v7x
topology: tpu7x:2x2x1
jax: 0.10.0
libtpu: 0.0.40
codegen_flags: <defaults>
</compile_context>

<pallas_src>
import functools

import numpy as np
import jax
import jax.numpy as jnp
from jax.experimental import pallas as pl
from jax.experimental.pallas import tpu as pltpu


# ----------------------------------------------------------------------------
# Helpers
# ----------------------------------------------------------------------------

def _round_up(x, m):
    return ((x + m - 1) // m) * m


def _choose_row_tile(m, target=512):
    """Row tile: multiple of 8, capped at `target`, and (when possible) at least two grid
    steps so both TensorCores of a v7x chip get work."""
    mp = _round_up(max(m, 1), 8)
    t = min(target, mp)
    if t >= mp and mp > 8:
        t = _round_up((mp + 1) // 2, 8)
    return t


def _prep_layers(layers):
    """Fold the BN affine scale into the conv weight (bf16 MXU operand); keep the shift in
    f32 for the VPU add."""
    ws, ts = [], []
    for (w, scale, shift) in layers:
        ws.append((w.astype(jnp.float32) * scale[None, :]).astype(jnp.bfloat16))
        ts.append(shift.reshape(1, -1).astype(jnp.float32))
    return ws, ts


# ----------------------------------------------------------------------------
# Pallas kernels
# ----------------------------------------------------------------------------

def _mlp_bank_kernel(x_ref, *refs, n_layers, relu_flags):
    # x: (TM, Cin) f32 ; refs = (w0, t0, ..., w_{n-1}, t_{n-1}, o_ref)
    o_ref = refs[-1]
    h = x_ref[...]
    for l in range(n_layers):
        w = refs[2 * l][...]        # (C_l, C_{l+1}) bf16, BN scale folded in
        t = refs[2 * l + 1][...]    # (1, C_{l+1}) f32
        h = jnp.dot(h.astype(jnp.bfloat16), w,
                    preferred_element_type=jnp.float32) + t
        if relu_flags[l]:
            h = jnp.maximum(h, 0.0)
    o_ref[...] = h


def _sa_bank_pool_kernel(feat_ref, valid_ref, *refs, n_layers):
    # feat: (TS, K, Cin) f32, valid: (TS, K, 1) f32 in {0,1}; K is a multiple of 8.
    # refs = (w0, t0, ..., o_ref) with o: (TS, Cout)
    o_ref = refs[-1]
    TS, K, Cin = feat_ref.shape
    h = feat_ref[...].reshape(TS * K, Cin)        # lane dim (Cin) preserved
    for l in range(n_layers):
        w = refs[2 * l][...]
        t = refs[2 * l + 1][...]
        h = jnp.dot(h.astype(jnp.bfloat16), w,
                    preferred_element_type=jnp.float32) + t
        h = jnp.maximum(h, 0.0)
    Cout = h.shape[-1]
    h = h.reshape(TS, K, Cout)                    # K back on the sublane axis
    # Masked max over neighbours; -1e30 sentinel is unreachable for real rows because the
    # centroid itself is always a valid (distance-0) neighbour.
    h = jnp.where(valid_ref[...] > 0.5, h, jnp.float32(-1e30))
    o_ref[...] = jnp.max(h, axis=1)


# ----------------------------------------------------------------------------
# Pallas wrappers
# ----------------------------------------------------------------------------

def mlp_bank(x2d, layers, relu_flags=None, lane_pad=False, row_tile=512):
    """Fused Conv1d(k=1)+BN(+ReLU) bank.  x2d: [M, Cin] -> [M, Cout_last]."""
    M, Cin = x2d.shape
    n = len(layers)
    if relu_flags is None:
        relu_flags = (True,) * n
    ws, ts = _prep_layers(layers)
    Cout = ws[-1].shape[1]
    Cp = _round_up(Cout, 128) if lane_pad else Cout
    if Cp != Cout:  # lane-dense final store; padded columns come out exactly zero
        ws[-1] = jnp.pad(ws[-1], ((0, 0), (0, Cp - Cout)))
        ts[-1] = jnp.pad(ts[-1], ((0, 0), (0, Cp - Cout)))
    tm = _choose_row_tile(M, row_tile)
    Mp = _round_up(M, tm)
    xp = jnp.pad(x2d.astype(jnp.float32), ((0, Mp - M), (0, 0)))

    operands = [xp]
    in_specs = [pl.BlockSpec((tm, Cin), lambda i: (i, 0))]
    for w, t in zip(ws, ts):
        operands += [w, t]
        in_specs += [pl.BlockSpec(w.shape, lambda i: (0, 0)),
                     pl.BlockSpec(t.shape, lambda i: (0, 0))]

    kern = functools.partial(_mlp_bank_kernel, n_layers=n,
                             relu_flags=tuple(bool(r) for r in relu_flags))
    out = pl.pallas_call(
        kern,
        out_shape=jax.ShapeDtypeStruct((Mp, Cp), jnp.float32),
        grid=(Mp // tm,),
        in_specs=in_specs,
        out_specs=pl.BlockSpec((tm, Cp), lambda i: (i, 0)),
        compiler_params=pltpu.CompilerParams(dimension_semantics=("parallel",)),
    )(*operands)
    return out[:M, :Cout]


def sa_bank_pool(feat, valid, layers, row_tile=256):
    """Fused shared-MLP bank + masked max-pool over the K neighbours.
    feat: [M, K, Cin], valid: [M, K] in {0,1}  ->  [M, Cout_last]."""
    M, K, Cin = feat.shape
    n = len(layers)
    ws, ts = _prep_layers(layers)
    Cout = ws[-1].shape[1]

    Kp = _round_up(K, 8)                         # sublane-align the neighbour axis
    if Kp != K:
        feat = jnp.pad(feat, ((0, 0), (0, Kp - K), (0, 0)))
        valid = jnp.pad(valid, ((0, 0), (0, Kp - K)))

    tm = _choose_row_tile(M, row_tile)
    Mp = _round_up(M, tm)
    featp = jnp.pad(feat.astype(jnp.float32), ((0, Mp - M), (0, 0), (0, 0)))
    validp = jnp.pad(valid.astype(jnp.float32), ((0, Mp - M), (0, 0)))[:, :, None]

    operands = [featp, validp]
    in_specs = [pl.BlockSpec((tm, Kp, Cin), lambda i: (i, 0, 0)),
                pl.BlockSpec((tm, Kp, 1), lambda i: (i, 0, 0))]
    for w, t in zip(ws, ts):
        operands += [w, t]
        in_specs += [pl.BlockSpec(w.shape, lambda i: (0, 0)),
                     pl.BlockSpec(t.shape, lambda i: (0, 0))]

    kern = functools.partial(_sa_bank_pool_kernel, n_layers=n)
    out = pl.pallas_call(
        kern,
        out_shape=jax.ShapeDtypeStruct((Mp, Cout), jnp.float32),
        grid=(Mp // tm,),
        in_specs=in_specs,
        out_specs=pl.BlockSpec((tm, Cout), lambda i: (i, 0)),
        compiler_params=pltpu.CompilerParams(dimension_semantics=("parallel",)),
    )(*operands)
    return out[:M]


# ----------------------------------------------------------------------------
# JAX glue: sampling / grouping / set abstraction / feature propagation
# ----------------------------------------------------------------------------

def gather_points(x, idx):
    # x: [B, N, C], idx: [B, ...] int -> [B, ..., C]
    return jax.vmap(lambda xb, ib: xb[ib])(x, idx)


def ball_group(x, centroids, K, radius):
    # TODO(synk): Grouping class source not provided; deterministic K-NN ball query
    # (K nearest via lax.top_k, -1 for neighbours outside the radius).
    d2 = jnp.sum((centroids[:, :, None, :] - x[:, None, :, :]) ** 2, axis=-1)  # [B,S,N]
    neg_d, order = jax.lax.top_k(-d2, K)
    order = order.astype(jnp.int32)
    return jnp.where(-neg_d <= radius * radius, order, -1)


def set_abstraction(x, x_complete, mlp_params, S, K, radius, use_x):
    """One single-scale PointNetSetAbstraction with pooling_operation='max'."""
    B, N, _ = x.shape
    # TODO(synk): Sampling class (FPS) source not provided; strided deterministic sampling.
    idx_ds = (jnp.arange(S) * (N // S)).astype(jnp.int32)
    centroids = x[:, idx_ds, :]                                    # [B, S, 3]
    idx = ball_group(x, centroids, K, radius)                      # [B, S, K]
    safe = jnp.maximum(idx, 0)
    grouped_x = gather_points(x, safe) - centroids[:, :, None, :]  # relative coords
    if x_complete is None:
        feat = grouped_x                                           # flag_nofeatures path
    else:
        gc = gather_points(x_complete, safe)
        feat = jnp.concatenate([gc, grouped_x], axis=3) if use_x else gc
    Cin = feat.shape[-1]
    valid = (idx >= 0).astype(jnp.float32).reshape(B * S, K)
    pooled = sa_bank_pool(feat.reshape(B * S, K, Cin), valid, mlp_params)  # [B*S, Cout]
    return centroids, pooled.reshape(B, S, -1)                     # ([B,S,3], [B,S,Cout])


def feature_propagation(xyz_dense, xyz_sparse, feat_dense, feat_sparse,
                        mlp_params, use_dense):
    """PointNetFeaturePropagation: 3-NN inverse-distance interpolation + shared MLP."""
    # TODO(synk): PointNetFeaturePropagation source not provided; standard PointNet++ FP.
    d2 = jnp.sum((xyz_dense[:, :, None, :] - xyz_sparse[:, None, :, :]) ** 2, axis=-1)
    k = min(3, xyz_sparse.shape[1])
    neg_d, order = jax.lax.top_k(-d2, k)                           # top-k, not full argsort
    order = order.astype(jnp.int32)
    w = 1.0 / (-neg_d + 1e-8)
    w = w / jnp.sum(w, axis=-1, keepdims=True)
    neigh = gather_points(feat_sparse, order)                      # [B, Nd, k, Cs]
    interp = jnp.sum(neigh * w[..., None], axis=2)                 # [B, Nd, Cs]
    if use_dense and feat_dense is not None:
        h = jnp.concatenate([feat_dense, interp], axis=-1)
    else:
        h = interp
    B, Nd, C = h.shape
    out = mlp_bank(h.reshape(B * Nd, C), mlp_params)
    return out.reshape(B, Nd, -1)


# ----------------------------------------------------------------------------
# Parameters (deterministic init) and full forward
# ----------------------------------------------------------------------------

def make_conv_bn(key, cin, cout):
    k1, k2 = jax.random.split(key)
    bound = 1.0 / np.sqrt(cin)
    w = jax.random.uniform(k1, (cin, cout), jnp.float32, -bound, bound)
    b = jax.random.uniform(k2, (cout,), jnp.float32, -bound, bound)
    eps = 1e-5
    # BN eval with fresh stats: gamma=1, beta=0, mean=0, var=1
    scale = jnp.ones((cout,), jnp.float32) / jnp.sqrt(1.0 + eps)
    shift = b * scale
    return (w, scale, shift)


def build_params(key):
    keys = list(jax.random.split(key, 16))
    p = {}
    p["sa1"] = [make_conv_bn(keys[0], 3, 16), make_conv_bn(keys[1], 16, 16)]   # 3 -> 16 -> 16
    p["sa2"] = [make_conv_bn(keys[2], 19, 32), make_conv_bn(keys[3], 32, 32)]  # (16+3) -> 32 -> 32
    p["sa3"] = [make_conv_bn(keys[4], 35, 32), make_conv_bn(keys[5], 32, 64)]  # (32+3) -> 32 -> 64
    p["fp1"] = [make_conv_bn(keys[6], 96, 32)]                                 # (32+64) -> 32
    p["fp2"] = [make_conv_bn(keys[7], 48, 32)]                                 # (16+32) -> 32
    p["fp3"] = [make_conv_bn(keys[8], 35, 32), make_conv_bn(keys[9], 32, 32)]  # (3+32) -> 32 -> 32
    p["head1"] = make_conv_bn(keys[10], 32, 32)                                # conv1d1 + bn1
    k1, k2 = jax.random.split(keys[11])
    bound = 1.0 / np.sqrt(32)
    p["head2_w"] = jax.random.uniform(k1, (32, 5), jnp.float32, -bound, bound)  # conv1d2 -> num_parts
    p["head2_b"] = jax.random.uniform(k2, (5,), jnp.float32, -bound, bound)
    return p


def pointnet2_forward(x, params):
    # x: [B, N, 3]; x_complete = None, labels_cat = None (num_classes = 0)
    c1, x1 = set_abstraction(x, None, params["sa1"], S=16, K=8, radius=0.8, use_x=True)
    c2, x2 = set_abstraction(c1, x1, params["sa2"], S=8, K=8, radius=1.2, use_x=True)
    c3, x3 = set_abstraction(c2, x2, params["sa3"], S=4, K=4, radius=1.6, use_x=True)
    x4 = feature_propagation(c2, c3, x2, x3, params["fp1"], True)
    x5 = feature_propagation(c1, c2, x1, x4, params["fp2"], True)
    x0 = x  # labels_cat is None and x_complete is None
    x6 = feature_propagation(x[:, :, :3], c1, x0, x5, params["fp3"], True)
    B, N, _ = x6.shape
    # Fused head: conv1d1 + bn1 + relu, dropout (eval -> identity), conv1d2 (no BN / ReLU).
    w2 = params["head2_w"]
    head = [params["head1"],
            (w2, jnp.ones((w2.shape[1],), jnp.float32), params["head2_b"])]
    h = mlp_bank(x6.reshape(B * N, -1), head, relu_flags=(True, False), lane_pad=True)
    return h.reshape(B, N, -1)                                     # [B, N, num_parts]


if __name__ == "__main__":
    key = jax.random.PRNGKey(0)
    kx, kp = jax.random.split(key)
    B, N = 2, 32
    x = jax.random.normal(kx, (B, N, 3), jnp.float32)
    params = build_params(kp)
    fwd = jax.jit(pointnet2_forward)
    out = jax.block_until_ready(fwd(x, params))
    assert out.shape == (B, N, 5), out.shape
    assert bool(jnp.all(jnp.isfinite(out)))
    print("KERNEL_OK")
</pallas_src>

<mosaic_0001>
module attributes {stable_mosaic.version = 11 : i64} {
  func.func @_sa_bank_pool_kernel(%arg0: i32, %arg1: memref<16x8x3xf32, #tpu.memory_space<vmem>>, %arg2: memref<16x8x1xf32, #tpu.memory_space<vmem>>, %arg3: memref<3x16xbf16, #tpu.memory_space<vmem>>, %arg4: memref<1x16xf32, #tpu.memory_space<vmem>>, %arg5: memref<16x16xbf16, #tpu.memory_space<vmem>>, %arg6: memref<1x16xf32, #tpu.memory_space<vmem>>, %arg7: memref<16x16xf32, #tpu.memory_space<vmem>>) attributes {dimension_semantics = [#tpu.dimension_semantics<parallel>], iteration_bounds = array<i64: 2>, scalar_prefetch = 0 : i64, scratch_operands = 0 : i64, tpu.core_type = #tpu.core_type<tc>, window_params = [{transform_indices = @transform_0, window_bounds = array<i64: 16, 8, 3>}, {transform_indices = @transform_1, window_bounds = array<i64: 16, 8, 1>}, {pipeline_mode = #tpu.pipeline_mode<synchronous>, transform_indices = @transform_2, window_bounds = array<i64: 3, 16>}, {pipeline_mode = #tpu.pipeline_mode<synchronous>, transform_indices = @transform_3, window_bounds = array<i64: 1, 16>}, {pipeline_mode = #tpu.pipeline_mode<synchronous>, transform_indices = @transform_4, window_bounds = array<i64: 16, 16>}, {pipeline_mode = #tpu.pipeline_mode<synchronous>, transform_indices = @transform_5, window_bounds = array<i64: 1, 16>}, {transform_indices = @transform_6, window_bounds = array<i64: 16, 16>}]} {
    %c0 = arith.constant 0 : index
    %c0_0 = arith.constant 0 : index
    %c0_1 = arith.constant 0 : index
    %0 = vector.load %arg1[%c0, %c0_0, %c0_1] : memref<16x8x3xf32, #tpu.memory_space<vmem>>, vector<16x8x3xf32>
    %1 = vector.shape_cast %0 : vector<16x8x3xf32> to vector<128x3xf32>
    %c0_2 = arith.constant 0 : index
    %c0_3 = arith.constant 0 : index
    %2 = vector.load %arg3[%c0_2, %c0_3] : memref<3x16xbf16, #tpu.memory_space<vmem>>, vector<3x16xbf16>
    %c0_4 = arith.constant 0 : index
    %c0_5 = arith.constant 0 : index
    %3 = vector.load %arg4[%c0_4, %c0_5] : memref<1x16xf32, #tpu.memory_space<vmem>>, vector<1x16xf32>
    %4 = arith.truncf %1 : vector<128x3xf32> to vector<128x3xbf16>
    %cst = arith.constant dense<0.000000e+00> : vector<128x16xf32>
    %5 = tpu.matmul %4, %2, %cst {dimension_numbers = #tpu.dot_dimension_numbers<[1], [0], [0], [1], [0, 0, 1, 1], [], []>} : vector<128x3xbf16>, vector<3x16xbf16>, vector<128x16xf32> -> vector<128x16xf32>
    %6 = vector.broadcast %3 : vector<1x16xf32> to vector<128x16xf32>
    %7 = arith.addf %5, %6 : vector<128x16xf32>
    %cst_6 = arith.constant 0.000000e+00 : f32
    %8 = vector.broadcast %cst_6 : f32 to vector<128x16xf32>
    %9 = arith.maximumf %7, %8 : vector<128x16xf32>
    %c0_7 = arith.constant 0 : index
    %c0_8 = arith.constant 0 : index
    %10 = vector.load %arg5[%c0_7, %c0_8] : memref<16x16xbf16, #tpu.memory_space<vmem>>, vector<16x16xbf16>
    %c0_9 = arith.constant 0 : index
    %c0_10 = arith.constant 0 : index
    %11 = vector.load %arg6[%c0_9, %c0_10] : memref<1x16xf32, #tpu.memory_space<vmem>>, vector<1x16xf32>
    %12 = arith.truncf %9 : vector<128x16xf32> to vector<128x16xbf16>
    %cst_11 = arith.constant dense<0.000000e+00> : vector<128x16xf32>
    %13 = tpu.matmul %12, %10, %cst_11 {dimension_numbers = #tpu.dot_dimension_numbers<[1], [0], [0], [1], [0, 0, 1, 1], [], []>} : vector<128x16xbf16>, vector<16x16xbf16>, vector<128x16xf32> -> vector<128x16xf32>
    %14 = vector.broadcast %11 : vector<1x16xf32> to vector<128x16xf32>
    %15 = arith.addf %13, %14 : vector<128x16xf32>
    %cst_12 = arith.constant 0.000000e+00 : f32
    %16 = vector.broadcast %cst_12 : f32 to vector<128x16xf32>
    %17 = arith.maximumf %15, %16 : vector<128x16xf32>
    %18 = vector.shape_cast %17 : vector<128x16xf32> to vector<16x8x16xf32>
    %c0_13 = arith.constant 0 : index
    %c0_14 = arith.constant 0 : index
    %c0_15 = arith.constant 0 : index
    %19 = vector.load %arg2[%c0_13, %c0_14, %c0_15] : memref<16x8x1xf32, #tpu.memory_space<vmem>>, vector<16x8x1xf32>
    %cst_16 = arith.constant 5.000000e-01 : f32
    %20 = vector.broadcast %cst_16 : f32 to vector<16x8x1xf32>
    %21 = arith.cmpf ogt, %19, %20 : vector<16x8x1xf32>
    %cst_17 = arith.constant -1.000000e+30 : f32
    %22 = vector.shape_cast %21 : vector<16x8x1xi1> to vector<16x8x1xi1>
    %23 = vector.broadcast %22 : vector<16x8x1xi1> to vector<16x8x16xi1>
    %24 = vector.broadcast %cst_17 : f32 to vector<16x8x16xf32>
    %25 = arith.select %23, %18, %24 : vector<16x8x16xi1>, vector<16x8x16xf32>
    %cst_18 = arith.constant dense<0xFF800000> : vector<16x16xf32>
    %26 = vector.multi_reduction <maximumf>, %25, %cst_18 [1] : vector<16x8x16xf32> to vector<16x16xf32>
    %c0_19 = arith.constant 0 : index
    %c0_20 = arith.constant 0 : index
    %27 = vector.load %arg7[%c0_19, %c0_20] : memref<16x16xf32, #tpu.memory_space<vmem>>, vector<16x16xf32>
    tpu.vector_store %arg7[%c0_19, %c0_20], %26 {strides = array<i32>} : memref<16x16xf32, #tpu.memory_space<vmem>>, vector<16x16xf32>,
    return
  }
  func.func @transform_0(%arg0: i32) -> (i32, i32, i32) {
    %c0_i32 = arith.constant 0 : i32
    %c0_i32_0 = arith.constant 0 : i32
    %c0_i32_1 = arith.constant 0 : i32
    return %arg0, %c0_i32, %c0_i32_0 : i32, i32, i32
  }
  func.func @transform_1(%arg0: i32) -> (i32, i32, i32) {
    %c0_i32 = arith.constant 0 : i32
    %c0_i32_0 = arith.constant 0 : i32
    %c0_i32_1 = arith.constant 0 : i32
    return %arg0, %c0_i32, %c0_i32_0 : i32, i32, i32
  }
  func.func @transform_2(%arg0: i32) -> (i32, i32) {
    %c0_i32 = arith.constant 0 : i32
    %c0_i32_0 = arith.constant 0 : i32
    %c0_i32_1 = arith.constant 0 : i32
    return %c0_i32, %c0_i32_0 : i32, i32
  }
  func.func @transform_3(%arg0: i32) -> (i32, i32) {
    %c0_i32 = arith.constant 0 : i32
    %c0_i32_0 = arith.constant 0 : i32
    %c0_i32_1 = arith.constant 0 : i32
    return %c0_i32, %c0_i32_0 : i32, i32
  }
  func.func @transform_4(%arg0: i32) -> (i32, i32) {
    %c0_i32 = arith.constant 0 : i32
    %c0_i32_0 = arith.constant 0 : i32
    %c0_i32_1 = arith.constant 0 : i32
    return %c0_i32, %c0_i32_0 : i32, i32
  }
  func.func @transform_5(%arg0: i32) -> (i32, i32) {
    %c0_i32 = arith.constant 0 : i32
    %c0_i32_0 = arith.constant 0 : i32
    %c0_i32_1 = arith.constant 0 : i32
    return %c0_i32, %c0_i32_0 : i32, i32
  }
  func.func @transform_6(%arg0: i32) -> (i32, i32) {
    %c0_i32 = arith.constant 0 : i32
    %c0_i32_0 = arith.constant 0 : i32
    return %arg0, %c0_i32 : i32, i32
  }
}

module attributes {stable_mosaic.version = 11 : i64} {
  func.func @_sa_bank_pool_kernel(%arg0: i32, %arg1: memref<8x8x19xf32, #tpu.memory_space<vmem>>, %arg2: memref<8x8x1xf32, #tpu.memory_space<vmem>>, %arg3: memref<19x32xbf16, #tpu.memory_space<vmem>>, %arg4: memref<1x32xf32, #tpu.memory_space<vmem>>, %arg5: memref<32x32xbf16, #tpu.memory_space<vmem>>, %arg6: memref<1x32xf32, #tpu.memory_space<vmem>>, %arg7: memref<8x32xf32, #tpu.memory_space<vmem>>) attributes {dimension_semantics = [#tpu.dimension_semantics<parallel>], iteration_bounds = array<i64: 2>, scalar_prefetch = 0 : i64, scratch_operands = 0 : i64, tpu.core_type = #tpu.core_type<tc>, window_params = [{transform_indices = @transform_0, window_bounds = array<i64: 8, 8, 19>}, {transform_indices = @transform_1, window_bounds = array<i64: 8, 8, 1>}, {pipeline_mode = #tpu.pipeline_mode<synchronous>, transform_indices = @transform_2, window_bounds = array<i64: 19, 32>}, {pipeline_mode = #tpu.pipeline_mode<synchronous>, transform_indices = @transform_3, window_bounds = array<i64: 1, 32>}, {pipeline_mode = #tpu.pipeline_mode<synchronous>, transform_indices = @transform_4, window_bounds = array<i64: 32, 32>}, {pipeline_mode = #tpu.pipeline_mode<synchronous>, transform_indices = @transform_5, window_bounds = array<i64: 1, 32>}, {transform_indices = @transform_6, window_bounds = array<i64: 8, 32>}]} {
    %c0 = arith.constant 0 : index
    %c0_0 = arith.constant 0 : index
    %c0_1 = arith.constant 0 : index
    %0 = vector.load %arg1[%c0, %c0_0, %c0_1] : memref<8x8x19xf32, #tpu.memory_space<vmem>>, vector<8x8x19xf32>
    %1 = vector.shape_cast %0 : vector<8x8x19xf32> to vector<64x19xf32>
    %c0_2 = arith.constant 0 : index
    %c0_3 = arith.constant 0 : index
    %2 = vector.load %arg3[%c0_2, %c0_3] : memref<19x32xbf16, #tpu.memory_space<vmem>>, vector<19x32xbf16>
    %c0_4 = arith.constant 0 : index
    %c0_5 = arith.constant 0 : index
    %3 = vector.load %arg4[%c0_4, %c0_5] : memref<1x32xf32, #tpu.memory_space<vmem>>, vector<1x32xf32>
    %4 = arith.truncf %1 : vector<64x19xf32> to vector<64x19xbf16>
    %cst = arith.constant dense<0.000000e+00> : vector<64x32xf32>
    %5 = tpu.matmul %4, %2, %cst {dimension_numbers = #tpu.dot_dimension_numbers<[1], [0], [0], [1], [0, 0, 1, 1], [], []>} : vector<64x19xbf16>, vector<19x32xbf16>, vector<64x32xf32> -> vector<64x32xf32>
    %6 = vector.broadcast %3 : vector<1x32xf32> to vector<64x32xf32>
    %7 = arith.addf %5, %6 : vector<64x32xf32>
    %cst_6 = arith.constant 0.000000e+00 : f32
    %8 = vector.broadcast %cst_6 : f32 to vector<64x32xf32>
    %9 = arith.maximumf %7, %8 : vector<64x32xf32>
    %c0_7 = arith.constant 0 : index
    %c0_8 = arith.constant 0 : index
    %10 = vector.load %arg5[%c0_7, %c0_8] : memref<32x32xbf16, #tpu.memory_space<vmem>>, vector<32x32xbf16>
    %c0_9 = arith.constant 0 : index
    %c0_10 = arith.constant 0 : index
    %11 = vector.load %arg6[%c0_9, %c0_10] : memref<1x32xf32, #tpu.memory_space<vmem>>, vector<1x32xf32>
    %12 = arith.truncf %9 : vector<64x32xf32> to vector<64x32xbf16>
    %cst_11 = arith.constant dense<0.000000e+00> : vector<64x32xf32>
    %13 = tpu.matmul %12, %10, %cst_11 {dimension_numbers = #tpu.dot_dimension_numbers<[1], [0], [0], [1], [0, 0, 1, 1], [], []>} : vector<64x32xbf16>, vector<32x32xbf16>, vector<64x32xf32> -> vector<64x32xf32>
    %14 = vector.broadcast %11 : vector<1x32xf32> to vector<64x32xf32>
    %15 = arith.addf %13, %14 : vector<64x32xf32>
    %cst_12 = arith.constant 0.000000e+00 : f32
    %16 = vector.broadcast %cst_12 : f32 to vector<64x32xf32>
    %17 = arith.maximumf %15, %16 : vector<64x32xf32>
    %18 = vector.shape_cast %17 : vector<64x32xf32> to vector<8x8x32xf32>
    %c0_13 = arith.constant 0 : index
    %c0_14 = arith.constant 0 : index
    %c0_15 = arith.constant 0 : index
    %19 = vector.load %arg2[%c0_13, %c0_14, %c0_15] : memref<8x8x1xf32, #tpu.memory_space<vmem>>, vector<8x8x1xf32>
    %cst_16 = arith.constant 5.000000e-01 : f32
    %20 = vector.broadcast %cst_16 : f32 to vector<8x8x1xf32>
    %21 = arith.cmpf ogt, %19, %20 : vector<8x8x1xf32>
    %cst_17 = arith.constant -1.000000e+30 : f32
    %22 = vector.shape_cast %21 : vector<8x8x1xi1> to vector<8x8x1xi1>
    %23 = vector.broadcast %22 : vector<8x8x1xi1> to vector<8x8x32xi1>
    %24 = vector.broadcast %cst_17 : f32 to vector<8x8x32xf32>
    %25 = arith.select %23, %18, %24 : vector<8x8x32xi1>, vector<8x8x32xf32>
    %cst_18 = arith.constant dense<0xFF800000> : vector<8x32xf32>
    %26 = vector.multi_reduction <maximumf>, %25, %cst_18 [1] : vector<8x8x32xf32> to vector<8x32xf32>
    %c0_19 = arith.constant 0 : index
    %c0_20 = arith.constant 0 : index
    %27 = vector.load %arg7[%c0_19, %c0_20] : memref<8x32xf32, #tpu.memory_space<vmem>>, vector<8x32xf32>
    tpu.vector_store %arg7[%c0_19, %c0_20], %26 {strides = array<i32>} : memref<8x32xf32, #tpu.memory_space<vmem>>, vector<8x32xf32>,
    return
  }
  func.func @transform_0(%arg0: i32) -> (i32, i32, i32) {
    %c0_i32 = arith.constant 0 : i32
    %c0_i32_0 = arith.constant 0 : i32
    %c0_i32_1 = arith.constant 0 : i32
    return %arg0, %c0_i32, %c0_i32_0 : i32, i32, i32
  }
  func.func @transform_1(%arg0: i32) -> (i32, i32, i32) {
    %c0_i32 = arith.constant 0 : i32
    %c0_i32_0 = arith.constant 0 : i32
    %c0_i32_1 = arith.constant 0 : i32
    return %arg0, %c0_i32, %c0_i32_0 : i32, i32, i32
  }
  func.func @transform_2(%arg0: i32) -> (i32, i32) {
    %c0_i32 = arith.constant 0 : i32
    %c0_i32_0 = arith.constant 0 : i32
    %c0_i32_1 = arith.constant 0 : i32
    return %c0_i32, %c0_i32_0 : i32, i32
  }
  func.func @transform_3(%arg0: i32) -> (i32, i32) {
    %c0_i32 = arith.constant 0 : i32
    %c0_i32_0 = arith.constant 0 : i32
    %c0_i32_1 = arith.constant 0 : i32
    return %c0_i32, %c0_i32_0 : i32, i32
  }
  func.func @transform_4(%arg0: i32) -> (i32, i32) {
    %c0_i32 = arith.constant 0 : i32
    %c0_i32_0 = arith.constant 0 : i32
    %c0_i32_1 = arith.constant 0 : i32
    return %c0_i32, %c0_i32_0 : i32, i32
  }
  func.func @transform_5(%arg0: i32) -> (i32, i32) {
    %c0_i32 = arith.constant 0 : i32
    %c0_i32_0 = arith.constant 0 : i32
    %c0_i32_1 = arith.constant 0 : i32
    return %c0_i32, %c0_i32_0 : i32, i32
  }
  func.func @transform_6(%arg0: i32) -> (i32, i32) {
    %c0_i32 = arith.constant 0 : i32
    %c0_i32_0 = arith.constant 0 : i32
    return %arg0, %c0_i32 : i32, i32
  }
}

module attributes {stable_mosaic.version = 11 : i64} {
  func.func @_sa_bank_pool_kernel(%arg0: i32, %arg1: memref<8x8x35xf32, #tpu.memory_space<vmem>>, %arg2: memref<8x8x1xf32, #tpu.memory_space<vmem>>, %arg3: memref<35x32xbf16, #tpu.memory_space<vmem>>, %arg4: memref<1x32xf32, #tpu.memory_space<vmem>>, %arg5: memref<32x64xbf16, #tpu.memory_space<vmem>>, %arg6: memref<1x64xf32, #tpu.memory_space<vmem>>, %arg7: memref<8x64xf32, #tpu.memory_space<vmem>>) attributes {dimension_semantics = [#tpu.dimension_semantics<parallel>], iteration_bounds = array<i64: 1>, scalar_prefetch = 0 : i64, scratch_operands = 0 : i64, tpu.core_type = #tpu.core_type<tc>, window_params = [{transform_indices = @transform_0, window_bounds = array<i64: 8, 8, 35>}, {transform_indices = @transform_1, window_bounds = array<i64: 8, 8, 1>}, {pipeline_mode = #tpu.pipeline_mode<synchronous>, transform_indices = @transform_2, window_bounds = array<i64: 35, 32>}, {pipeline_mode = #tpu.pipeline_mode<synchronous>, transform_indices = @transform_3, window_bounds = array<i64: 1, 32>}, {pipeline_mode = #tpu.pipeline_mode<synchronous>, transform_indices = @transform_4, window_bounds = array<i64: 32, 64>}, {pipeline_mode = #tpu.pipeline_mode<synchronous>, transform_indices = @transform_5, window_bounds = array<i64: 1, 64>}, {transform_indices = @transform_6, window_bounds = array<i64: 8, 64>}]} {
    %c0 = arith.constant 0 : index
    %c0_0 = arith.constant 0 : index
    %c0_1 = arith.constant 0 : index
    %0 = vector.load %arg1[%c0, %c0_0, %c0_1] : memref<8x8x35xf32, #tpu.memory_space<vmem>>, vector<8x8x35xf32>
    %1 = vector.shape_cast %0 : vector<8x8x35xf32> to vector<64x35xf32>
    %c0_2 = arith.constant 0 : index
    %c0_3 = arith.constant 0 : index
    %2 = vector.load %arg3[%c0_2, %c0_3] : memref<35x32xbf16, #tpu.memory_space<vmem>>, vector<35x32xbf16>
    %c0_4 = arith.constant 0 : index
    %c0_5 = arith.constant 0 : index
    %3 = vector.load %arg4[%c0_4, %c0_5] : memref<1x32xf32, #tpu.memory_space<vmem>>, vector<1x32xf32>
    %4 = arith.truncf %1 : vector<64x35xf32> to vector<64x35xbf16>
    %cst = arith.constant dense<0.000000e+00> : vector<64x32xf32>
    %5 = tpu.matmul %4, %2, %cst {dimension_numbers = #tpu.dot_dimension_numbers<[1], [0], [0], [1], [0, 0, 1, 1], [], []>} : vector<64x35xbf16>, vector<35x32xbf16>, vector<64x32xf32> -> vector<64x32xf32>
    %6 = vector.broadcast %3 : vector<1x32xf32> to vector<64x32xf32>
    %7 = arith.addf %5, %6 : vector<64x32xf32>
    %cst_6 = arith.constant 0.000000e+00 : f32
    %8 = vector.broadcast %cst_6 : f32 to vector<64x32xf32>
    %9 = arith.maximumf %7, %8 : vector<64x32xf32>
    %c0_7 = arith.constant 0 : index
    %c0_8 = arith.constant 0 : index
    %10 = vector.load %arg5[%c0_7, %c0_8] : memref<32x64xbf16, #tpu.memory_space<vmem>>, vector<32x64xbf16>
    %c0_9 = arith.constant 0 : index
    %c0_10 = arith.constant 0 : index
    %11 = vector.load %arg6[%c0_9, %c0_10] : memref<1x64xf32, #tpu.memory_space<vmem>>, vector<1x64xf32>
    %12 = arith.truncf %9 : vector<64x32xf32> to vector<64x32xbf16>
    %cst_11 = arith.constant dense<0.000000e+00> : vector<64x64xf32>
    %13 = tpu.matmul %12, %10, %cst_11 {dimension_numbers = #tpu.dot_dimension_numbers<[1], [0], [0], [1], [0, 0, 1, 1], [], []>} : vector<64x32xbf16>, vector<32x64xbf16>, vector<64x64xf32> -> vector<64x64xf32>
    %14 = vector.broadcast %11 : vector<1x64xf32> to vector<64x64xf32>
    %15 = arith.addf %13, %14 : vector<64x64xf32>
    %cst_12 = arith.constant 0.000000e+00 : f32
    %16 = vector.broadcast %cst_12 : f32 to vector<64x64xf32>
    %17 = arith.maximumf %15, %16 : vector<64x64xf32>
    %18 = vector.shape_cast %17 : vector<64x64xf32> to vector<8x8x64xf32>
    %c0_13 = arith.constant 0 : index
    %c0_14 = arith.constant 0 : index
    %c0_15 = arith.constant 0 : index
    %19 = vector.load %arg2[%c0_13, %c0_14, %c0_15] : memref<8x8x1xf32, #tpu.memory_space<vmem>>, vector<8x8x1xf32>
    %cst_16 = arith.constant 5.000000e-01 : f32
    %20 = vector.broadcast %cst_16 : f32 to vector<8x8x1xf32>
    %21 = arith.cmpf ogt, %19, %20 : vector<8x8x1xf32>
    %cst_17 = arith.constant -1.000000e+30 : f32
    %22 = vector.shape_cast %21 : vector<8x8x1xi1> to vector<8x8x1xi1>
    %23 = vector.broadcast %22 : vector<8x8x1xi1> to vector<8x8x64xi1>
    %24 = vector.broadcast %cst_17 : f32 to vector<8x8x64xf32>
    %25 = arith.select %23, %18, %24 : vector<8x8x64xi1>, vector<8x8x64xf32>
    %cst_18 = arith.constant dense<0xFF800000> : vector<8x64xf32>
    %26 = vector.multi_reduction <maximumf>, %25, %cst_18 [1] : vector<8x8x64xf32> to vector<8x64xf32>
    %c0_19 = arith.constant 0 : index
    %c0_20 = arith.constant 0 : index
    %27 = vector.load %arg7[%c0_19, %c0_20] : memref<8x64xf32, #tpu.memory_space<vmem>>, vector<8x64xf32>
    tpu.vector_store %arg7[%c0_19, %c0_20], %26 {strides = array<i32>} : memref<8x64xf32, #tpu.memory_space<vmem>>, vector<8x64xf32>,
    return
  }
  func.func @transform_0(%arg0: i32) -> (i32, i32, i32) {
    %c0_i32 = arith.constant 0 : i32
    %c0_i32_0 = arith.constant 0 : i32
    %c0_i32_1 = arith.constant 0 : i32
    return %arg0, %c0_i32, %c0_i32_0 : i32, i32, i32
  }
  func.func @transform_1(%arg0: i32) -> (i32, i32, i32) {
    %c0_i32 = arith.constant 0 : i32
    %c0_i32_0 = arith.constant 0 : i32
    %c0_i32_1 = arith.constant 0 : i32
    return %arg0, %c0_i32, %c0_i32_0 : i32, i32, i32
  }
  func.func @transform_2(%arg0: i32) -> (i32, i32) {
    %c0_i32 = arith.constant 0 : i32
    %c0_i32_0 = arith.constant 0 : i32
    %c0_i32_1 = arith.constant 0 : i32
    return %c0_i32, %c0_i32_0 : i32, i32
  }
  func.func @transform_3(%arg0: i32) -> (i32, i32) {
    %c0_i32 = arith.constant 0 : i32
    %c0_i32_0 = arith.constant 0 : i32
    %c0_i32_1 = arith.constant 0 : i32
    return %c0_i32, %c0_i32_0 : i32, i32
  }
  func.func @transform_4(%arg0: i32) -> (i32, i32) {
    %c0_i32 = arith.constant 0 : i32
    %c0_i32_0 = arith.constant 0 : i32
    %c0_i32_1 = arith.constant 0 : i32
    return %c0_i32, %c0_i32_0 : i32, i32
  }
  func.func @transform_5(%arg0: i32) -> (i32, i32) {
    %c0_i32 = arith.constant 0 : i32
    %c0_i32_0 = arith.constant 0 : i32
    %c0_i32_1 = arith.constant 0 : i32
    return %c0_i32, %c0_i32_0 : i32, i32
  }
  func.func @transform_6(%arg0: i32) -> (i32, i32) {
    %c0_i32 = arith.constant 0 : i32
    %c0_i32_0 = arith.constant 0 : i32
    return %arg0, %c0_i32 : i32, i32
  }
}

module attributes {stable_mosaic.version = 11 : i64} {
  func.func @_mlp_bank_kernel(%arg0: i32, %arg1: memref<8x96xf32, #tpu.memory_space<vmem>>, %arg2: memref<96x32xbf16, #tpu.memory_space<vmem>>, %arg3: memref<1x32xf32, #tpu.memory_space<vmem>>, %arg4: memref<8x32xf32, #tpu.memory_space<vmem>>) attributes {dimension_semantics = [#tpu.dimension_semantics<parallel>], iteration_bounds = array<i64: 2>, scalar_prefetch = 0 : i64, scratch_operands = 0 : i64, tpu.core_type = #tpu.core_type<tc>, window_params = [{transform_indices = @transform_0, window_bounds = array<i64: 8, 96>}, {pipeline_mode = #tpu.pipeline_mode<synchronous>, transform_indices = @transform_1, window_bounds = array<i64: 96, 32>}, {pipeline_mode = #tpu.pipeline_mode<synchronous>, transform_indices = @transform_2, window_bounds = array<i64: 1, 32>}, {transform_indices = @transform_3, window_bounds = array<i64: 8, 32>}]} {
    %c0 = arith.constant 0 : index
    %c0_0 = arith.constant 0 : index
    %0 = vector.load %arg1[%c0, %c0_0] : memref<8x96xf32, #tpu.memory_space<vmem>>, vector<8x96xf32>
    %c0_1 = arith.constant 0 : index
    %c0_2 = arith.constant 0 : index
    %1 = vector.load %arg2[%c0_1, %c0_2] : memref<96x32xbf16, #tpu.memory_space<vmem>>, vector<96x32xbf16>
    %c0_3 = arith.constant 0 : index
    %c0_4 = arith.constant 0 : index
    %2 = vector.load %arg3[%c0_3, %c0_4] : memref<1x32xf32, #tpu.memory_space<vmem>>, vector<1x32xf32>
    %3 = arith.truncf %0 : vector<8x96xf32> to vector<8x96xbf16>
    %cst = arith.constant dense<0.000000e+00> : vector<8x32xf32>
    %4 = tpu.matmul %3, %1, %cst {dimension_numbers = #tpu.dot_dimension_numbers<[1], [0], [0], [1], [0, 0, 1, 1], [], []>} : vector<8x96xbf16>, vector<96x32xbf16>, vector<8x32xf32> -> vector<8x32xf32>
    %5 = vector.broadcast %2 : vector<1x32xf32> to vector<8x32xf32>
    %6 = arith.addf %4, %5 : vector<8x32xf32>
    %cst_5 = arith.constant 0.000000e+00 : f32
    %7 = vector.broadcast %cst_5 : f32 to vector<8x32xf32>
    %8 = arith.maximumf %6, %7 : vector<8x32xf32>
    %c0_6 = arith.constant 0 : index
    %c0_7 = arith.constant 0 : index
    %9 = vector.load %arg4[%c0_6, %c0_7] : memref<8x32xf32, #tpu.memory_space<vmem>>, vector<8x32xf32>
    tpu.vector_store %arg4[%c0_6, %c0_7], %8 {strides = array<i32>} : memref<8x32xf32, #tpu.memory_space<vmem>>, vector<8x32xf32>,
    return
  }
  func.func @transform_0(%arg0: i32) -> (i32, i32) {
    %c0_i32 = arith.constant 0 : i32
    %c0_i32_0 = arith.constant 0 : i32
    return %arg0, %c0_i32 : i32, i32
  }
  func.func @transform_1(%arg0: i32) -> (i32, i32) {
    %c0_i32 = arith.constant 0 : i32
    %c0_i32_0 = arith.constant 0 : i32
    %c0_i32_1 = arith.constant 0 : i32
    return %c0_i32, %c0_i32_0 : i32, i32
  }
  func.func @transform_2(%arg0: i32) -> (i32, i32) {
    %c0_i32 = arith.constant 0 : i32
    %c0_i32_0 = arith.constant 0 : i32
    %c0_i32_1 = arith.constant 0 : i32
    return %c0_i32, %c0_i32_0 : i32, i32
  }
  func.func @transform_3(%arg0: i32) -> (i32, i32) {
    %c0_i32 = arith.constant 0 : i32
    %c0_i32_0 = arith.constant 0 : i32
    return %arg0, %c0_i32 : i32, i32
  }
}

module attributes {stable_mosaic.version = 11 : i64} {
  func.func @_mlp_bank_kernel(%arg0: i32, %arg1: memref<16x48xf32, #tpu.memory_space<vmem>>, %arg2: memref<48x32xbf16, #tpu.memory_space<vmem>>, %arg3: memref<1x32xf32, #tpu.memory_space<vmem>>, %arg4: memref<16x32xf32, #tpu.memory_space<vmem>>) attributes {dimension_semantics = [#tpu.dimension_semantics<parallel>], iteration_bounds = array<i64: 2>, scalar_prefetch = 0 : i64, scratch_operands = 0 : i64, tpu.core_type = #tpu.core_type<tc>, window_params = [{transform_indices = @transform_0, window_bounds = array<i64: 16, 48>}, {pipeline_mode = #tpu.pipeline_mode<synchronous>, transform_indices = @transform_1, window_bounds = array<i64: 48, 32>}, {pipeline_mode = #tpu.pipeline_mode<synchronous>, transform_indices = @transform_2, window_bounds = array<i64: 1, 32>}, {transform_indices = @transform_3, window_bounds = array<i64: 16, 32>}]} {
    %c0 = arith.constant 0 : index
    %c0_0 = arith.constant 0 : index
    %0 = vector.load %arg1[%c0, %c0_0] : memref<16x48xf32, #tpu.memory_space<vmem>>, vector<16x48xf32>
    %c0_1 = arith.constant 0 : index
    %c0_2 = arith.constant 0 : index
    %1 = vector.load %arg2[%c0_1, %c0_2] : memref<48x32xbf16, #tpu.memory_space<vmem>>, vector<48x32xbf16>
    %c0_3 = arith.constant 0 : index
    %c0_4 = arith.constant 0 : index
    %2 = vector.load %arg3[%c0_3, %c0_4] : memref<1x32xf32, #tpu.memory_space<vmem>>, vector<1x32xf32>
    %3 = arith.truncf %0 : vector<16x48xf32> to vector<16x48xbf16>
    %cst = arith.constant dense<0.000000e+00> : vector<16x32xf32>
    %4 = tpu.matmul %3, %1, %cst {dimension_numbers = #tpu.dot_dimension_numbers<[1], [0], [0], [1], [0, 0, 1, 1], [], []>} : vector<16x48xbf16>, vector<48x32xbf16>, vector<16x32xf32> -> vector<16x32xf32>
    %5 = vector.broadcast %2 : vector<1x32xf32> to vector<16x32xf32>
    %6 = arith.addf %4, %5 : vector<16x32xf32>
    %cst_5 = arith.constant 0.000000e+00 : f32
    %7 = vector.broadcast %cst_5 : f32 to vector<16x32xf32>
    %8 = arith.maximumf %6, %7 : vector<16x32xf32>
    %c0_6 = arith.constant 0 : index
    %c0_7 = arith.constant 0 : index
    %9 = vector.load %arg4[%c0_6, %c0_7] : memref<16x32xf32, #tpu.memory_space<vmem>>, vector<16x32xf32>
    tpu.vector_store %arg4[%c0_6, %c0_7], %8 {strides = array<i32>} : memref<16x32xf32, #tpu.memory_space<vmem>>, vector<16x32xf32>,
    return
  }
  func.func @transform_0(%arg0: i32) -> (i32, i32) {
    %c0_i32 = arith.constant 0 : i32
    %c0_i32_0 = arith.constant 0 : i32
    return %arg0, %c0_i32 : i32, i32
  }
  func.func @transform_1(%arg0: i32) -> (i32, i32) {
    %c0_i32 = arith.constant 0 : i32
    %c0_i32_0 = arith.constant 0 : i32
    %c0_i32_1 = arith.constant 0 : i32
    return %c0_i32, %c0_i32_0 : i32, i32
  }
  func.func @transform_2(%arg0: i32) -> (i32, i32) {
    %c0_i32 = arith.constant 0 : i32
    %c0_i32_0 = arith.constant 0 : i32
    %c0_i32_1 = arith.constant 0 : i32
    return %c0_i32, %c0_i32_0 : i32, i32
  }
  func.func @transform_3(%arg0: i32) -> (i32, i32) {
    %c0_i32 = arith.constant 0 : i32
    %c0_i32_0 = arith.constant 0 : i32
    return %arg0, %c0_i32 : i32, i32
  }
}

module attributes {stable_mosaic.version = 11 : i64} {
  func.func @_mlp_bank_kernel(%arg0: i32, %arg1: memref<32x35xf32, #tpu.memory_space<vmem>>, %arg2: memref<35x32xbf16, #tpu.memory_space<vmem>>, %arg3: memref<1x32xf32, #tpu.memory_space<vmem>>, %arg4: memref<32x32xbf16, #tpu.memory_space<vmem>>, %arg5: memref<1x32xf32, #tpu.memory_space<vmem>>, %arg6: memref<32x32xf32, #tpu.memory_space<vmem>>) attributes {dimension_semantics = [#tpu.dimension_semantics<parallel>], iteration_bounds = array<i64: 2>, scalar_prefetch = 0 : i64, scratch_operands = 0 : i64, tpu.core_type = #tpu.core_type<tc>, window_params = [{transform_indices = @transform_0, window_bounds = array<i64: 32, 35>}, {pipeline_mode = #tpu.pipeline_mode<synchronous>, transform_indices = @transform_1, window_bounds = array<i64: 35, 32>}, {pipeline_mode = #tpu.pipeline_mode<synchronous>, transform_indices = @transform_2, window_bounds = array<i64: 1, 32>}, {pipeline_mode = #tpu.pipeline_mode<synchronous>, transform_indices = @transform_3, window_bounds = array<i64: 32, 32>}, {pipeline_mode = #tpu.pipeline_mode<synchronous>, transform_indices = @transform_4, window_bounds = array<i64: 1, 32>}, {transform_indices = @transform_5, window_bounds = array<i64: 32, 32>}]} {
    %c0 = arith.constant 0 : index
    %c0_0 = arith.constant 0 : index
    %0 = vector.load %arg1[%c0, %c0_0] : memref<32x35xf32, #tpu.memory_space<vmem>>, vector<32x35xf32>
    %c0_1 = arith.constant 0 : index
    %c0_2 = arith.constant 0 : index
    %1 = vector.load %arg2[%c0_1, %c0_2] : memref<35x32xbf16, #tpu.memory_space<vmem>>, vector<35x32xbf16>
    %c0_3 = arith.constant 0 : index
    %c0_4 = arith.constant 0 : index
    %2 = vector.load %arg3[%c0_3, %c0_4] : memref<1x32xf32, #tpu.memory_space<vmem>>, vector<1x32xf32>
    %3 = arith.truncf %0 : vector<32x35xf32> to vector<32x35xbf16>
    %cst = arith.constant dense<0.000000e+00> : vector<32x32xf32>
    %4 = tpu.matmul %3, %1, %cst {dimension_numbers = #tpu.dot_dimension_numbers<[1], [0], [0], [1], [0, 0, 1, 1], [], []>} : vector<32x35xbf16>, vector<35x32xbf16>, vector<32x32xf32> -> vector<32x32xf32>
    %5 = vector.broadcast %2 : vector<1x32xf32> to vector<32x32xf32>
    %6 = arith.addf %4, %5 : vector<32x32xf32>
    %cst_5 = arith.constant 0.000000e+00 : f32
    %7 = vector.broadcast %cst_5 : f32 to vector<32x32xf32>
    %8 = arith.maximumf %6, %7 : vector<32x32xf32>
    %c0_6 = arith.constant 0 : index
    %c0_7 = arith.constant 0 : index
    %9 = vector.load %arg4[%c0_6, %c0_7] : memref<32x32xbf16, #tpu.memory_space<vmem>>, vector<32x32xbf16>
    %c0_8 = arith.constant 0 : index
    %c0_9 = arith.constant 0 : index
    %10 = vector.load %arg5[%c0_8, %c0_9] : memref<1x32xf32, #tpu.memory_space<vmem>>, vector<1x32xf32>
    %11 = arith.truncf %8 : vector<32x32xf32> to vector<32x32xbf16>
    %cst_10 = arith.constant dense<0.000000e+00> : vector<32x32xf32>
    %12 = tpu.matmul %11, %9, %cst_10 {dimension_numbers = #tpu.dot_dimension_numbers<[1], [0], [0], [1], [0, 0, 1, 1], [], []>} : vector<32x32xbf16>, vector<32x32xbf16>, vector<32x32xf32> -> vector<32x32xf32>
    %13 = vector.broadcast %10 : vector<1x32xf32> to vector<32x32xf32>
    %14 = arith.addf %12, %13 : vector<32x32xf32>
    %cst_11 = arith.constant 0.000000e+00 : f32
    %15 = vector.broadcast %cst_11 : f32 to vector<32x32xf32>
    %16 = arith.maximumf %14, %15 : vector<32x32xf32>
    %c0_12 = arith.constant 0 : index
    %c0_13 = arith.constant 0 : index
    %17 = vector.load %arg6[%c0_12, %c0_13] : memref<32x32xf32, #tpu.memory_space<vmem>>, vector<32x32xf32>
    tpu.vector_store %arg6[%c0_12, %c0_13], %16 {strides = array<i32>} : memref<32x32xf32, #tpu.memory_space<vmem>>, vector<32x32xf32>,
    return
  }
  func.func @transform_0(%arg0: i32) -> (i32, i32) {
    %c0_i32 = arith.constant 0 : i32
    %c0_i32_0 = arith.constant 0 : i32
    return %arg0, %c0_i32 : i32, i32
  }
  func.func @transform_1(%arg0: i32) -> (i32, i32) {
    %c0_i32 = arith.constant 0 : i32
    %c0_i32_0 = arith.constant 0 : i32
    %c0_i32_1 = arith.constant 0 : i32
    return %c0_i32, %c0_i32_0 : i32, i32
  }
  func.func @transform_2(%arg0: i32) -> (i32, i32) {
    %c0_i32 = arith.constant 0 : i32
    %c0_i32_0 = arith.constant 0 : i32
    %c0_i32_1 = arith.constant 0 : i32
    return %c0_i32, %c0_i32_0 : i32, i32
  }
  func.func @transform_3(%arg0: i32) -> (i32, i32) {
    %c0_i32 = arith.constant 0 : i32
    %c0_i32_0 = arith.constant 0 : i32
    %c0_i32_1 = arith.constant 0 : i32
    return %c0_i32, %c0_i32_0 : i32, i32
  }
  func.func @transform_4(%arg0: i32) -> (i32, i32) {
    %c0_i32 = arith.constant 0 : i32
    %c0_i32_0 = arith.constant 0 : i32
    %c0_i32_1 = arith.constant 0 : i32
    return %c0_i32, %c0_i32_0 : i32, i32
  }
  func.func @transform_5(%arg0: i32) -> (i32, i32) {
    %c0_i32 = arith.constant 0 : i32
    %c0_i32_0 = arith.constant 0 : i32
    return %arg0, %c0_i32 : i32, i32
  }
}

module attributes {stable_mosaic.version = 11 : i64} {
  func.func @_mlp_bank_kernel(%arg0: i32, %arg1: memref<32x32xf32, #tpu.memory_space<vmem>>, %arg2: memref<32x32xbf16, #tpu.memory_space<vmem>>, %arg3: memref<1x32xf32, #tpu.memory_space<vmem>>, %arg4: memref<32x128xbf16, #tpu.memory_space<vmem>>, %arg5: memref<1x128xf32, #tpu.memory_space<vmem>>, %arg6: memref<32x128xf32, #tpu.memory_space<vmem>>) attributes {dimension_semantics = [#tpu.dimension_semantics<parallel>], iteration_bounds = array<i64: 2>, scalar_prefetch = 0 : i64, scratch_operands = 0 : i64, tpu.core_type = #tpu.core_type<tc>, window_params = [{transform_indices = @transform_0, window_bounds = array<i64: 32, 32>}, {pipeline_mode = #tpu.pipeline_mode<synchronous>, transform_indices = @transform_1, window_bounds = array<i64: 32, 32>}, {pipeline_mode = #tpu.pipeline_mode<synchronous>, transform_indices = @transform_2, window_bounds = array<i64: 1, 32>}, {pipeline_mode = #tpu.pipeline_mode<synchronous>, transform_indices = @transform_3, window_bounds = array<i64: 32, 128>}, {pipeline_mode = #tpu.pipeline_mode<synchronous>, transform_indices = @transform_4, window_bounds = array<i64: 1, 128>}, {transform_indices = @transform_5, window_bounds = array<i64: 32, 128>}]} {
    %c0 = arith.constant 0 : index
    %c0_0 = arith.constant 0 : index
    %0 = vector.load %arg1[%c0, %c0_0] : memref<32x32xf32, #tpu.memory_space<vmem>>, vector<32x32xf32>
    %c0_1 = arith.constant 0 : index
    %c0_2 = arith.constant 0 : index
    %1 = vector.load %arg2[%c0_1, %c0_2] : memref<32x32xbf16, #tpu.memory_space<vmem>>, vector<32x32xbf16>
    %c0_3 = arith.constant 0 : index
    %c0_4 = arith.constant 0 : index
    %2 = vector.load %arg3[%c0_3, %c0_4] : memref<1x32xf32, #tpu.memory_space<vmem>>, vector<1x32xf32>
    %3 = arith.truncf %0 : vector<32x32xf32> to vector<32x32xbf16>
    %cst = arith.constant dense<0.000000e+00> : vector<32x32xf32>
    %4 = tpu.matmul %3, %1, %cst {dimension_numbers = #tpu.dot_dimension_numbers<[1], [0], [0], [1], [0, 0, 1, 1], [], []>} : vector<32x32xbf16>, vector<32x32xbf16>, vector<32x32xf32> -> vector<32x32xf32>
    %5 = vector.broadcast %2 : vector<1x32xf32> to vector<32x32xf32>
    %6 = arith.addf %4, %5 : vector<32x32xf32>
    %cst_5 = arith.constant 0.000000e+00 : f32
    %7 = vector.broadcast %cst_5 : f32 to vector<32x32xf32>
    %8 = arith.maximumf %6, %7 : vector<32x32xf32>
    %c0_6 = arith.constant 0 : index
    %c0_7 = arith.constant 0 : index
    %9 = vector.load %arg4[%c0_6, %c0_7] : memref<32x128xbf16, #tpu.memory_space<vmem>>, vector<32x128xbf16>
    %c0_8 = arith.constant 0 : index
    %c0_9 = arith.constant 0 : index
    %10 = vector.load %arg5[%c0_8, %c0_9] : memref<1x128xf32, #tpu.memory_space<vmem>>, vector<1x128xf32>
    %11 = arith.truncf %8 : vector<32x32xf32> to vector<32x32xbf16>
    %cst_10 = arith.constant dense<0.000000e+00> : vector<32x128xf32>
    %12 = tpu.matmul %11, %9, %cst_10 {dimension_numbers = #tpu.dot_dimension_numbers<[1], [0], [0], [1], [0, 0, 1, 1], [], []>} : vector<32x32xbf16>, vector<32x128xbf16>, vector<32x128xf32> -> vector<32x128xf32>
    %13 = vector.broadcast %10 : vector<1x128xf32> to vector<32x128xf32>
    %14 = arith.addf %12, %13 : vector<32x128xf32>
    %c0_11 = arith.constant 0 : index
    %c0_12 = arith.constant 0 : index
    %15 = vector.load %arg6[%c0_11, %c0_12] : memref<32x128xf32, #tpu.memory_space<vmem>>, vector<32x128xf32>
    tpu.vector_store %arg6[%c0_11, %c0_12], %14 {strides = array<i32>} : memref<32x128xf32, #tpu.memory_space<vmem>>, vector<32x128xf32>,
    return
  }
  func.func @transform_0(%arg0: i32) -> (i32, i32) {
    %c0_i32 = arith.constant 0 : i32
    %c0_i32_0 = arith.constant 0 : i32
    return %arg0, %c0_i32 : i32, i32
  }
  func.func @transform_1(%arg0: i32) -> (i32, i32) {
    %c0_i32 = arith.constant 0 : i32
    %c0_i32_0 = arith.constant 0 : i32
    %c0_i32_1 = arith.constant 0 : i32
    return %c0_i32, %c0_i32_0 : i32, i32
  }
  func.func @transform_2(%arg0: i32) -> (i32, i32) {
    %c0_i32 = arith.constant 0 : i32
    %c0_i32_0 = arith.constant 0 : i32
    %c0_i32_1 = arith.constant 0 : i32
    return %c0_i32, %c0_i32_0 : i32, i32
  }
  func.func @transform_3(%arg0: i32) -> (i32, i32) {
    %c0_i32 = arith.constant 0 : i32
    %c0_i32_0 = arith.constant 0 : i32
    %c0_i32_1 = arith.constant 0 : i32
    return %c0_i32, %c0_i32_0 : i32, i32
  }
  func.func @transform_4(%arg0: i32) -> (i32, i32) {
    %c0_i32 = arith.constant 0 : i32
    %c0_i32_0 = arith.constant 0 : i32
    %c0_i32_1 = arith.constant 0 : i32
    return %c0_i32, %c0_i32_0 : i32, i32
  }
  func.func @transform_5(%arg0: i32) -> (i32, i32) {
    %c0_i32 = arith.constant 0 : i32
    %c0_i32_0 = arith.constant 0 : i32
    return %arg0, %c0_i32 : i32, i32
  }
}

</mosaic_0001>

<bundles_post_ra>
// kernel: neg.12
= control target key start
LH: loop header
LB: loop body
LE: loop exit
PB: predicated region body
PF: predicated region fallthrough
CT: control target
= control target key end

     0   :  { %s72_s0 = inlined_call_operand.vmem [shape: f32[2,16,32], index: 0, kind: input, shape index: {}]   ;;  %s73_s1 = inlined_call_operand.vmem [shape: f32[2,16,32], index: 1, kind: output, shape index: {}]  }
   0x1   :  { %v2_v0 = vld [vmem:[%s72_s0] sm:$0xff]  ;;  %v32_v1 = vld [vmem:[%s72_s0 + $0x10] sm:$0xff]  ;;  %v34_v2 = vld [vmem:[%s72_s0 + $0x8] sm:$0xff] }
   0x2   :  { %v5_v3 = vxor.u32 2147483648, %v2_v0  ;;  %v12_v4 = vxor.u32 2147483648, %v32_v1  ;;  %v20_v5 = vxor.u32 2147483648, %v34_v2  ;;  %v36_v6 = vld [vmem:[%s72_s0 + $0x18] sm:$0xff] }
   0x3   :  { %v28_v7 = vxor.u32 2147483648, %v36_v6 }
   0x4   :  { %7 = vst [vmem:[%s73_s1] sm:$0xff] %v5_v3  ;;  %33 = vst [vmem:[%s73_s1 + $0x10] sm:$0xff] %v12_v4 }
   0x5   :  { %35 = vst [vmem:[%s73_s1 + $0x8] sm:$0xff] %v20_v5  ;;  %37 = vst [vmem:[%s73_s1 + $0x18] sm:$0xff] %v28_v7 }

// kernel: neg.14
= control target key start
LH: loop header
LB: loop body
LE: loop exit
PB: predicated region body
PF: predicated region fallthrough
CT: control target
= control target key end

     0   :  { %s40_s0 = inlined_call_operand.vmem [shape: f32[2,8,16], index: 0, kind: input, shape index: {}]   ;;  %s41_s1 = inlined_call_operand.vmem [shape: f32[2,8,16], index: 1, kind: output, shape index: {}]  }
   0x1   :  { %v2_v0 = vld [vmem:[%s40_s0] sm:$0xff]  ;;  %v16_v1 = vld [vmem:[%s40_s0 + $0x8] sm:$0xff] }
   0x2   :  { %v5_v2 = vxor.u32 2147483648, %v2_v0  ;;  %v12_v3 = vxor.u32 2147483648, %v16_v1 }
   0x4   :  { %7 = vst [vmem:[%s41_s1] sm:$0xff] %v5_v2  ;;  %17 = vst [vmem:[%s41_s1 + $0x8] sm:$0xff] %v12_v3 }

// kernel: pointnet2_forward.7
= control target key start
LH: loop header
LB: loop body
LE: loop exit
PB: predicated region body
PF: predicated region fallthrough
CT: control target
= control target key end

     0   :  { %s1109_s21 = smov 0   ;;  %s1330_s0 = inlined_call_operand.vmem [shape: f32[32,8,3], index: 0, kind: input, shape index: {}]   ;;  %s1331_s1 = inlined_call_operand.vmem [shape: f32[32,8,1], index: 1, kind: input, shape index: {}]   ;;  %s1332_s2 = inlined_call_operand.vmem [shape: bf16[3,16], index: 2, kind: input, shape index: {}]   ;;  %s1333_s3 = inlined_call_operand.vmem [shape: f32[1,16], index: 3, kind: input, shape index: {}]   ;;  %s1334_s4 = inlined_call_operand.vmem [shape: bf16[16,16], index: 4, kind: input, shape index: {}]   ;;  %s1335_s5 = inlined_call_operand.vmem [shape: f32[1,16], index: 5, kind: input, shape index: {}]   ;;  %s1336_s6 = inlined_call_operand.vmem [shape: f32[32,16], index: 6, kind: output, shape index: {}]  }
   0x1 LB: > { %s965_s22 = sadd.s32 4294967295, %s1070_s21   ;;  %p969_p0 = scmp.ge.s32.totalorder %s1070_s21, 1  ;;  %s1070_s21 = sphi %s1109_s21, %s16_s21  }
   0x2   : > { %p224_p1 = scmp.lt.s32.totalorder %s1070_s21, 3 }
   0x4   : > { %p225_p2 = pnand %p969_p0, %p224_p1 }
   0x5   : > { %v294_v0 = vld [vmem:[%s1332_s2] sm:$0x3] (!%p225_p2)  ;;  %vm335_vm0 = vcmask (!%p225_p2), 1040384   ;;  %vm336_vm1 = vcmask (!%p225_p2), 1041408   ;;  %s970_s25 = sshll.u32 (!%p225_p2), %s965_s22, 4  ;;  %v1072_v1 = vmov (!%p225_p2), 65535  }
   0x6   : > { %228 = sbr.rel (%p225_p2) target bundleno = 513 (0x201), region = 44  ;;  %v337_v2 = vsel (!%p225_p2), %vm335_vm0, 4294967295, %v1072_v1  ;;  %p260_p3 = scmp.lt.s32.totalorder (!%p225_p2), %s970_s25, 31  ;;  %vm310_vm2 = vcmask (!%p225_p2), 23552   ;;  %v1063_v29 = vld [vmem:[%s1334_s4] sm:$0xff] (!%p225_p2)   ;;  %v1073_v30 = vmov (!%p225_p2), 0  }
   0x7   : > { %v338_v3 = vsel (!%p225_p2), %vm336_vm1, %v337_v2, 0  ;;  %1033 = vmatprep.subr.bf16.mxu1 (!%p225_p2), %v1063_v29  ;;  %1061 = vset.pattern.permute.xlu0 (!%p225_p2), %v1073_v30  ;;  %v976_v63 = vld [vmem:[%s1333_s3] ss:$0 sm:$0xff] (!%p225_p2)  ;;  %s1262_s15 = sshll.u32 (!%p225_p2), %s965_s22, 1 }
   0x8   : > { %v340_v4 = vand.u32 (!%p225_p2), %v338_v3, %v294_v0  ;;  %1034 = vmatpush3.bf16.msra.mxu1 (!%p225_p2), %v1063_v29  ;;  %1062 = vset.pattern.permute.xlu1 (!%p225_p2), %v1073_v30  ;;  %p272_p4 = scmp.lt.s32.totalorder (!%p225_p2), %s1262_s15, 3 }
   0xa   : > { %1015 = vmatprep.subr.bf16.mxu0 (!%p225_p2), %v340_v4 }
   0xb   : > { %1016 = vmatpush3.bf16.msra.mxu0 (!%p225_p2), %v340_v4 }
   0xd   : > { %s1338_s25 = smov (!%p260_p3, %s970_s25), 31  ;;  %s1340_s15 = smov (!%p272_p4, %s1262_s15), 3 }
   0xe   : > { %s971_s26 = sshll.u32 %s1338_s25, 3  ;;  %s975_s16 = sshll.u32 %s1340_s15, 3 }
   0xf   : > { %s1130_s29 = scalar_lea.vmem %s1330_s0, %s971_s26  ;;  %s1164_s10 = scalar_lea.vmem %s1331_s1, %s971_s26 }
  0x10   : > { %v278_v5 = vld [vmem:[%s1130_s29] sm:$0xff]  ;;  %v279_v6 = vld [vmem:[%s1130_s29 + $0x8] sm:$0xff]  ;;  %v280_v7 = vld [vmem:[%s1130_s29 + $0x10] sm:$0xff]  ;;  %s1306_s19 = scalar_lea.vmem %s1336_s6, %s975_s16 }
  0x11   : > { %v296_v8 = vpack.c.bf16 %v279_v6, %v278_v5  ;;  %v281_v9 = vld [vmem:[%s1130_s29 + $0x18] sm:$0xff]  ;;  %v282_v10 = vld [vmem:[%s1130_s29 + $0x20] sm:$0xff]  ;;  %v283_v11 = vld [vmem:[%s1130_s29 + $0x28] sm:$0xff] }
  0x12   : > { %v297_v12 = vpack.c.bf16 %v281_v9, %v280_v7  ;;  %v298_v13 = vpack.c.bf16 %v283_v11, %v282_v10  ;;  %v284_v14 = vld [vmem:[%s1130_s29 + $0x30] sm:$0xff]  ;;  %v285_v15 = vld [vmem:[%s1130_s29 + $0x38] sm:$0xff]  ;;  %v286_v16 = vld [vmem:[%s1130_s29 + $0x40] sm:$0xff] }
  0x13   : > { %1017 = vmatprep.mubr.msk.bf16.mxu0 %vm310_vm2, %v296_v8  ;;  %v287_v17 = vld [vmem:[%s1130_s29 + $0x48] sm:$0xff]  ;;  %v299_v18 = vpack.c.bf16 %v285_v15, %v284_v14  ;;  %v288_v20 = vld [vmem:[%s1130_s29 + $0x50] sm:$0xff]  ;;  %v289_v21 = vld [vmem:[%s1130_s29 + $0x58] sm:$0xff] }
  0x14   : > { %1018 = vmatmul.mubr.msk.bf16.vlgmr.msra.gmra.mrb[0].mxu0 %vm310_vm2, %v297_v12  ;;  %v300_v19 = vpack.c.bf16 %v287_v17, %v286_v16  ;;  %v290_v22 = vld [vmem:[%s1130_s29 + $0x60] sm:$0xff]  ;;  %v291_v23 = vld [vmem:[%s1130_s29 + $0x68] sm:$0xff]  ;;  %v301_v24 = vpack.c.bf16 %v289_v21, %v288_v20  ;;  %v292_v26 = vld [vmem:[%s1130_s29 + $0x70] sm:$0xff] }
  0x15   : > { %1021 = vmatprep.mubr.msk.bf16.mxu0 %vm310_vm2, %v298_v13  ;;  %v302_v25 = vpack.c.bf16 %v291_v23, %v290_v22  ;;  %v293_v27 = vld [vmem:[%s1130_s29 + $0x78] sm:$0xff]  ;;  %v616_v31 = vld [vmem:[%s1164_s10] sm:$0xff]  ;;  %v618_v32 = vld [vmem:[%s1164_s10 + $0x10] sm:$0xff] }
  0x16   : > { %v303_v28 = vpack.c.bf16 %v293_v27, %v292_v26  ;;  %v617_v33 = vld [vmem:[%s1164_s10 + $0x8] sm:$0xff]  ;;  %vm632_vm3 = vcmp.gt.f32.partialorder %v616_v31, 0.5  ;;  %vm634_vm4 = vcmp.gt.f32.partialorder %v618_v32, 0.5  ;;  %v624_v34 = vld [vmem:[%s1164_s10 + $0x40] sm:$0xff]  ;;  %v619_v38 = vld [vmem:[%s1164_s10 + $0x18] sm:$0xff] }
  0x17   : > { %vm633_vm5 = vcmp.gt.f32.partialorder %v617_v33, 0.5  ;;  %v648_v35 = vsel %vm632_vm3, 1, %v1073_v30  ;;  %v650_v36 = vsel %vm634_vm4, 1, %v1073_v30  ;;  %vm640_vm6 = vcmp.gt.f32.partialorder %v624_v34, 0.5  ;;  %v625_v37 = vld [vmem:[%s1164_s10 + $0x48] sm:$0xff]  ;;  %v626_v41 = vld [vmem:[%s1164_s10 + $0x50] sm:$0xff] }
  0x18   : > { %665 = vperm.xlu0 %1061, %v648_v35   ;;  %671 = vperm.xlu1 %1062, %v650_v36   ;;  %v649_v39 = vsel %vm633_vm5, 1, %v1073_v30  ;;  %v656_v40 = vsel %vm640_vm6, 1, %v1073_v30  ;;  %vm641_vm7 = vcmp.gt.f32.partialorder %v625_v37, 0.5  ;;  %vm635_vm8 = vcmp.gt.f32.partialorder %v619_v38, 0.5  ;;  %v620_v42 = vld [vmem:[%s1164_s10 + $0x20] sm:$0xff]  ;;  %v627_v45 = vld [vmem:[%s1164_s10 + $0x58] sm:$0xff] }
  0x19   : > { %v657_v43 = vsel %vm641_vm7, 1, %v1073_v30  ;;  %v651_v44 = vsel %vm635_vm8, 1, %v1073_v30  ;;  %vm642_vm9 = vcmp.gt.f32.partialorder %v626_v41, 0.5  ;;  %vm636_vm10 = vcmp.gt.f32.partialorder %v620_v42, 0.5  ;;  %v621_v46 = vld [vmem:[%s1164_s10 + $0x28] sm:$0xff]  ;;  %v628_v49 = vld [vmem:[%s1164_s10 + $0x60] sm:$0xff] }
  0x1a   : > { %v658_v47 = vsel %vm642_vm9, 1, %v1073_v30  ;;  %v652_v48 = vsel %vm636_vm10, 1, %v1073_v30  ;;  %vm643_vm11 = vcmp.gt.f32.partialorder %v627_v45, 0.5  ;;  %vm637_vm12 = vcmp.gt.f32.partialorder %v621_v46, 0.5  ;;  %v622_v50 = vld [vmem:[%s1164_s10 + $0x30] sm:$0xff]  ;;  %v629_v53 = vld [vmem:[%s1164_s10 + $0x68] sm:$0xff] }
  0x1b   : > { %v659_v51 = vsel %vm643_vm11, 1, %v1073_v30  ;;  %v653_v52 = vsel %vm637_vm12, 1, %v1073_v30  ;;  %vm644_vm13 = vcmp.gt.f32.partialorder %v628_v49, 0.5  ;;  %vm638_vm14 = vcmp.gt.f32.partialorder %v622_v50, 0.5  ;;  %v623_v54 = vld [vmem:[%s1164_s10 + $0x38] sm:$0xff]  ;;  %v630_v57 = vld [vmem:[%s1164_s10 + $0x70] sm:$0xff] }
  0x1c   : > { %1022 = vmatmul.mubr.msk.bf16.gmra.mrb[4].mxu0 %vm310_vm2, %v299_v18  ;;  %668 = vperm.xlu0 %1061, %v649_v39   ;;  %v660_v55 = vsel %vm644_vm13, 1, %v1073_v30  ;;  %v654_v56 = vsel %vm638_vm14, 1, %v1073_v30  ;;  %vm645_vm15 = vcmp.gt.f32.partialorder %v629_v53, 0.5  ;;  %vm639_vm0 = vcmp.gt.f32.partialorder %v623_v54, 0.5  ;;  %v631_v58 = vld [vmem:[%s1164_s10 + $0x78] sm:$0xff] }
  0x1d   : > { %1025 = vmatprep.mubr.msk.bf16.mxu0 %vm310_vm2, %v300_v19  ;;  %689 = vperm.xlu1 %1062, %v656_v40   ;;  %v661_v59 = vsel %vm645_vm15, 1, %v1073_v30  ;;  %v655_v60 = vsel %vm639_vm0, 1, %v1073_v30  ;;  %vm646_vm1 = vcmp.gt.f32.partialorder %v630_v57, 0.5  ;;  %vm478_vm3 = vcmask 130048  }
  0x1e   : > { %v662_v61 = vsel %vm646_vm1, 1, %v1073_v30  ;;  %vm872_vm11 = vcmask 1041409   ;;  %vm874_vm13 = vcmask 1042434   ;;  %vm876_vm14 = vcmask 1043459  }
  0x20   : > { %692 = vperm.xlu0 %1061, %v657_v43  }
  0x21   : > { %674 = vperm.xlu1 %1062, %v651_v44  }
  0x24   : > { %1026 = vmatmul.mubr.msk.bf16.gmra.mrb[8].mxu0 %vm310_vm2, %v301_v24  ;;  %695 = vperm.xlu0 %1061, %v658_v47  }
  0x25   : > { %1029 = vmatprep.mubr.msk.bf16.mxu0 %vm310_vm2, %v302_v25  ;;  %677 = vperm.xlu1 %1062, %v652_v48  }
  0x28   : > { %698 = vperm.xlu0 %1061, %v659_v51  }
  0x29   : > { %680 = vperm.xlu1 %1062, %v653_v52  }
  0x2c   : > { %1030 = vmatmul.mubr.msk.bf16.gmra.mrb[12].mxu0 %vm310_vm2, %v303_v28  ;;  %701 = vperm.xlu0 %1061, %v660_v55   ;;  %vm647_vm2 = vcmp.gt.f32.partialorder %v631_v58, 0.5 }
  0x2d   : > { %683 = vperm.xlu1 %1062, %v654_v56   ;;  %v663_v62 = vsel %vm647_vm2, 1, %v1073_v30 }
  0x30   : > { %704 = vperm.xlu0 %1061, %v661_v59  }
  0x31   : > { %686 = vperm.xlu1 %1062, %v655_v60  }
  0x34   : > { %707 = vperm.xlu0 %1061, %v662_v61  }
  0x35   : > { %710 = vperm.xlu1 %1062, %v663_v62  }
  0x97   : > { %v672_v56 = vpop.permute.xlu1 %671  ;;  %v666_v57 = vpop.permute.xlu0 %665 }
  0x98   : > { %vm714_vm4 = vcmp.eq.s32.totalorder %v672_v56, 1  ;;  %vm712_vm5 = vcmp.eq.s32.totalorder %v666_v57, 1 }
  0x9b   : > { %v669_v59 = vpop.permute.xlu0 %668 }
  0x9c   : > { %v1211_v58 = vpop.permute.xlu1 %689  ;;  %vm713_vm7 = vcmp.eq.s32.totalorder %v669_v59, 1 }
  0x9d   : > { %vm720_vm0 = vcmp.eq.s32.totalorder %v1211_v58, 1 }
  0x9f   : > { %v1213_v61 = vpop.permute.xlu0 %692 }
  0xa0   : > { %v675_v60 = vpop.permute.xlu1 %674  ;;  %vm721_vm2 = vcmp.eq.s32.totalorder %v1213_v61, 1 }
  0xa1   : > { %vm715_vm6 = vcmp.eq.s32.totalorder %v675_v60, 1 }
  0xa4   : > { %v1215_v62 = vpop.permute.xlu1 %677 }
  0xa5   : > { %vm716_vm8 = vcmp.eq.s32.totalorder %v1215_v62, 1 }
  0xe7   : > { %v1019_v0 = vpop.f32.mrb[0].mxu0 }
  0xe8   : > { %v385_v1 = vadd.f32 %v1019_v0, %v976_v63  ;;  %v376_v2 = vpop.f32.mrb[1].mxu0  ;;  %v1219_v0 = vpop.permute.xlu1 %680 }
  0xe9   : > { %v377_v3 = vadd.f32 %v976_v63, %v376_v2  ;;  %v1020_v4 = vpop.f32.mrb[2].mxu0  ;;  %vm717_vm12 = vcmp.eq.s32.totalorder %v1219_v0, 1 }
  0xea   : > { %v388_v5 = vadd.f32 %v1020_v4, %v976_v63  ;;  %v379_v6 = vpop.f32.mrb[3].mxu0  ;;  %v441_v8 = vmax.f32 %v385_v1, 0.0  ;;  %v1224_v1 = vld [vmem:[%s1335_s5] ss:$0 sm:$0xff] }
  0xeb   : > { %v380_v7 = vadd.f32 %v976_v63, %v379_v6  ;;  %v439_v10 = vmax.f32 %v377_v3, 0.0 }
  0xec   : > { %v442_v9 = vmax.f32 %v388_v5, 0.0 }
  0xed   : > { %v440_v11 = vmax.f32 %v380_v7, 0.0 }
  0xee   : > { %v459_v12 = vpack.c.bf16 %v442_v9, %v441_v8  ;;  %v684_v8 = vpop.permute.xlu1 %683 }
  0xef   : > { %v1023_v13 = vpop.f32.mrb[4].mxu0  ;;  %v458_v14 = vpack.c.bf16 %v440_v11, %v439_v10  ;;  %vm718_vm9 = vcmp.eq.s32.totalorder %v684_v8, 1 }
  0xf0   : > { %v401_v15 = vadd.f32 %v1023_v13, %v976_v63  ;;  %v392_v16 = vpop.f32.mrb[5].mxu0 }
  0xf1   : > { %v393_v17 = vadd.f32 %v976_v63, %v392_v16  ;;  %v1024_v18 = vpop.f32.mrb[6].mxu0  ;;  %1035 = vmatprep.mubr.msk.bf16.mxu1 %vm478_vm3, %v458_v14 }
  0xf2   : > { %v404_v19 = vadd.f32 %v1024_v18, %v976_v63  ;;  %v395_v20 = vpop.f32.mrb[7].mxu0  ;;  %1036 = vmatmul.mubr.msk.bf16.vlgmr.msra.gmra.mrb[0].mxu1 %vm478_vm3, %v459_v12  ;;  %v445_v22 = vmax.f32 %v401_v15, 0.0 }
  0xf3   : > { %v396_v21 = vadd.f32 %v976_v63, %v395_v20  ;;  %v443_v24 = vmax.f32 %v393_v17, 0.0 }
  0xf4   : > { %v446_v23 = vmax.f32 %v404_v19, 0.0 }
  0xf5   : > { %v444_v25 = vmax.f32 %v396_v21, 0.0 }
  0xf6   : > { %v461_v26 = vpack.c.bf16 %v446_v23, %v445_v22 }
  0xf7   : > { %v460_v27 = vpack.c.bf16 %v444_v25, %v443_v24  ;;  %v1027_v28 = vpop.f32.mrb[8].mxu0 }
  0xf8   : > { %v417_v29 = vadd.f32 %v1027_v28, %v976_v63  ;;  %v408_v30 = vpop.f32.mrb[9].mxu0 }
  0xf9   : > { %v409_v31 = vadd.f32 %v976_v63, %v408_v30  ;;  %v1028_v32 = vpop.f32.mrb[10].mxu0  ;;  %1039 = vmatprep.mubr.msk.bf16.mxu1 %vm478_vm3, %v460_v27  ;;  %v687_v27 = vpop.permute.xlu1 %686 }
  0xfa   : > { %v420_v33 = vadd.f32 %v1028_v32, %v976_v63  ;;  %v411_v34 = vpop.f32.mrb[11].mxu0  ;;  %1040 = vmatmul.mubr.msk.bf16.gmra.mrb[4].mxu1 %vm478_vm3, %v461_v26  ;;  %v449_v36 = vmax.f32 %v417_v29, 0.0  ;;  %vm719_vm10 = vcmp.eq.s32.totalorder %v687_v27, 1 }
  0xfb   : > { %v412_v35 = vadd.f32 %v976_v63, %v411_v34  ;;  %v447_v38 = vmax.f32 %v409_v31, 0.0 }
  0xfc   : > { %v450_v37 = vmax.f32 %v420_v33, 0.0 }
  0xfd   : > { %v448_v39 = vmax.f32 %v412_v35, 0.0 }
  0xfe   : > { %v463_v40 = vpack.c.bf16 %v450_v37, %v449_v36 }
  0xff   : > { %v462_v41 = vpack.c.bf16 %v448_v39, %v447_v38  ;;  %v1031_v42 = vpop.f32.mrb[12].mxu0 }
 0x100   : > { %v433_v43 = vadd.f32 %v1031_v42, %v976_v63  ;;  %v424_v44 = vpop.f32.mrb[13].mxu0 }
 0x101   : > { %v425_v45 = vadd.f32 %v976_v63, %v424_v44  ;;  %v1032_v46 = vpop.f32.mrb[14].mxu0  ;;  %1043 = vmatprep.mubr.msk.bf16.mxu1 %vm478_vm3, %v462_v41 }
 0x102   : > { %v436_v47 = vadd.f32 %v1032_v46, %v976_v63  ;;  %v427_v48 = vpop.f32.mrb[15].mxu0  ;;  %1044 = vmatmul.mubr.msk.bf16.gmra.mrb[8].mxu1 %vm478_vm3, %v463_v40  ;;  %v453_v50 = vmax.f32 %v433_v43, 0.0 }
 0x103   : > { %v428_v49 = vadd.f32 %v976_v63, %v427_v48  ;;  %v451_v52 = vmax.f32 %v425_v45, 0.0  ;;  %v1217_v63 = vpop.permute.xlu0 %695 }
 0x104   : > { %v454_v51 = vmax.f32 %v436_v47, 0.0  ;;  %vm722_vm15 = vcmp.eq.s32.totalorder %v1217_v63, 1 }
 0x105   : > { %v452_v53 = vmax.f32 %v428_v49, 0.0 }
 0x106   : > { %v465_v54 = vpack.c.bf16 %v454_v51, %v453_v50 }
 0x107   : > { %v464_v55 = vpack.c.bf16 %v452_v53, %v451_v52  ;;  %v1227_v5 = vpop.permute.xlu0 %698 }
 0x108   : > { %vm723_vm1 = vcmp.eq.s32.totalorder %v1227_v5, 1 }
 0x109   : > { %1047 = vmatprep.mubr.msk.bf16.mxu1 %vm478_vm3, %v464_v55 }
 0x10a   : > { %1048 = vmatmul.mubr.msk.bf16.gmra.mrb[12].mxu1 %vm478_vm3, %v465_v54 }
 0x10b   : > { %v1235_v22 = vpop.permute.xlu0 %701 }
 0x10f   : > { %v1246_v50 = vpop.permute.xlu0 %704 }
 0x1c5   : > { %v1037_v2 = vpop.f32.mrb[0].mxu1 }
 0x1c6   : > { %v546_v3 = vadd.f32 %v1037_v2, %v1224_v1  ;;  %v537_v4 = vpop.f32.mrb[1].mxu1 }
 0x1c7   : > { %v538_v6 = vadd.f32 %v1224_v1, %v537_v4  ;;  %v1038_v7 = vpop.f32.mrb[2].mxu1 }
 0x1c8   : > { %v602_v9 = vmax.f32 %v546_v3, 0.0  ;;  %v549_v10 = vadd.f32 %v1038_v7, %v1224_v1  ;;  %v540_v11 = vpop.f32.mrb[3].mxu1 }
 0x1c9   : > { %v600_v12 = vmax.f32 %v538_v6, 0.0  ;;  %v541_v13 = vadd.f32 %v1224_v1, %v540_v11 }
 0x1ca   : > { %v730_v14 = vsel %vm714_vm4, %v602_v9, -1e+30  ;;  %v603_v15 = vmax.f32 %v549_v10, 0.0 }
 0x1cb   : > { %v758_v16 = vsel %vm478_vm3, %v730_v14, -inf  ;;  %v728_v17 = vsel %vm712_vm5, %v600_v12, -1e+30  ;;  %v601_v18 = vmax.f32 %v541_v13, 0.0  ;;  %vm878_vm5 = vcmask 1044484  }
 0x1cc   : > { %v759_v19 = vrot.slane %v758_v16, 4  ;;  %v744_v20 = vsel %vm478_vm3, %v728_v17, -inf  ;;  %v731_v21 = vsel %vm715_vm6, %v603_v15, -1e+30  ;;  %vm880_vm6 = vcmask 1045509  }
 0x1cd   : > { %v745_v23 = vrot.slane %v744_v20, 4  ;;  %v765_v24 = vsel %vm478_vm3, %v731_v21, -inf  ;;  %v729_v25 = vsel %vm713_vm7, %v601_v18, -1e+30  ;;  %v1041_v26 = vpop.f32.mrb[4].mxu1  ;;  %v1257_v21 = vpop.permute.xlu0 %707  ;;  %vm724_vm7 = vcmp.eq.s32.totalorder %v1235_v22, 1 }
 0x1ce   : > { %v760_v28 = vmax.f32 %v758_v16, %v759_v19  ;;  %v766_v29 = vrot.slane %v765_v24, 4  ;;  %v751_v30 = vsel %vm478_vm3, %v729_v25, -inf  ;;  %v562_v31 = vadd.f32 %v1041_v26, %v1224_v1  ;;  %v553_v32 = vpop.f32.mrb[5].mxu1 }
 0x1cf   : > { %v746_v33 = vmax.f32 %v744_v20, %v745_v23  ;;  %v752_v34 = vrot.slane %v751_v30, 4  ;;  %v554_v35 = vadd.f32 %v1224_v1, %v553_v32  ;;  %v1042_v36 = vpop.f32.mrb[6].mxu1  ;;  %vm726_vm4 = vcmp.eq.s32.totalorder %v1257_v21, 1 }
 0x1d0   : > { %v761_v37 = vrot.slane %v760_v28, 2  ;;  %v767_v38 = vmax.f32 %v765_v24, %v766_v29  ;;  %v606_v39 = vmax.f32 %v562_v31, 0.0  ;;  %v565_v40 = vadd.f32 %v1042_v36, %v1224_v1  ;;  %v556_v41 = vpop.f32.mrb[7].mxu1 }
 0x1d1   : > { %v747_v42 = vrot.slane %v746_v33, 2  ;;  %v753_v43 = vmax.f32 %v751_v30, %v752_v34  ;;  %v604_v44 = vmax.f32 %v554_v35, 0.0  ;;  %v557_v45 = vadd.f32 %v1224_v1, %v556_v41 }
 0x1d2   : > { %v762_v46 = vmax.f32 %v760_v28, %v761_v37  ;;  %v768_v47 = vrot.slane %v767_v38, 2  ;;  %v734_v48 = vsel %vm718_vm9, %v606_v39, -1e+30  ;;  %v607_v49 = vmax.f32 %v565_v40, 0.0 }
 0x1d3   : > { %v748_v51 = vmax.f32 %v746_v33, %v747_v42  ;;  %v754_v52 = vrot.slane %v753_v43, 2  ;;  %v786_v53 = vsel %vm478_vm3, %v734_v48, -inf  ;;  %v732_v54 = vsel %vm716_vm8, %v604_v44, -1e+30 }
 0x1d4   : > { %v763_v55 = vrot.slane %v762_v46, 1  ;;  %v769_v56 = vmax.f32 %v767_v38, %v768_v47  ;;  %v787_v57 = vrot.slane %v786_v53, 4  ;;  %v772_v59 = vsel %vm478_vm3, %v732_v54, -inf }
 0x1d5   : > { %v749_v60 = vrot.slane %v748_v51, 1  ;;  %v755_v2 = vmax.f32 %v753_v43, %v754_v52  ;;  %v773_v3 = vrot.slane %v772_v59, 4  ;;  %v735_v4 = vsel %vm719_vm10, %v607_v49, -1e+30  ;;  %v1045_v6 = vpop.f32.mrb[8].mxu1 }
 0x1d6   : > { %v764_v7 = vmax.f32 %v762_v46, %v763_v55  ;;  %v770_v8 = vrot.slane %v769_v56, 1  ;;  %v788_v9 = vmax.f32 %v786_v53, %v787_v57  ;;  %v793_v10 = vsel %vm478_vm3, %v735_v4, -inf  ;;  %v569_v11 = vpop.f32.mrb[9].mxu1 }
 0x1d7   : > { %v750_v62 = vmax.f32 %v748_v51, %v749_v60  ;;  %v756_v12 = vrot.slane %v755_v2, 1  ;;  %v774_v13 = vmax.f32 %v772_v59, %v773_v3  ;;  %v794_v14 = vrot.slane %v793_v10, 4  ;;  %v1046_v15 = vpop.f32.mrb[10].mxu1 }
 0x1d8   : > { %v771_v16 = vmax.f32 %v769_v56, %v770_v8  ;;  %v789_v17 = vrot.slane %v788_v9, 2  ;;  %v605_v18 = vmax.f32 %v557_v45, 0.0  ;;  %v578_v19 = vadd.f32 %v1045_v6, %v1224_v1  ;;  %v572_v20 = vpop.f32.mrb[11].mxu1 }
 0x1d9   : > { %v757_v23 = vmax.f32 %v755_v2, %v756_v12  ;;  %v775_v24 = vrot.slane %v774_v13, 2  ;;  %v795_v25 = vmax.f32 %v793_v10, %v794_v14  ;;  %v570_v26 = vadd.f32 %v1224_v1, %v569_v11 }
 0x1da   : > { %v790_v27 = vmax.f32 %v788_v9, %v789_v17  ;;  %v733_v28 = vsel %vm717_vm12, %v605_v18, -1e+30  ;;  %v610_v29 = vmax.f32 %v578_v19, 0.0  ;;  %v581_v30 = vadd.f32 %v1046_v15, %v1224_v1 }
 0x1db   : > { %v873_v31 = vsel %vm872_vm11, %v757_v23, %v750_v62  ;;  %v776_v32 = vmax.f32 %v774_v13, %v775_v24  ;;  %v796_v33 = vrot.slane %v795_v25, 2  ;;  %v779_v34 = vsel %vm478_vm3, %v733_v28, -inf }
 0x1dc   : > { %v875_v35 = vsel %vm874_vm13, %v764_v7, %v873_v31  ;;  %v780_v36 = vrot.slane %v779_v34, 4  ;;  %v738_v0 = vsel %vm722_vm15, %v610_v29, -1e+30  ;;  %v791_v41 = vrot.slane %v790_v27, 1 }
 0x1dd   : > { %v777_v37 = vrot.slane %v776_v32, 1  ;;  %v877_v38 = vsel %vm876_vm14, %v771_v16, %v875_v35  ;;  %v814_v39 = vsel %vm478_vm3, %v738_v0, -inf  ;;  %v1049_v40 = vpop.f32.mrb[12].mxu1  ;;  %vm882_vm8 = vcmask 1046534  }
 0x1de   : > { %v781_v42 = vmax.f32 %v779_v34, %v780_v36  ;;  %v815_v43 = vrot.slane %v814_v39, 4  ;;  %v608_v44 = vmax.f32 %v570_v26, 0.0  ;;  %v585_v45 = vpop.f32.mrb[13].mxu1  ;;  %v797_v46 = vmax.f32 %v795_v25, %v796_v33  ;;  %v711_v26 = vpop.permute.xlu1 %710 }
 0x1df   : > { %v778_v63 = vmax.f32 %v776_v32, %v777_v37  ;;  %v611_v47 = vmax.f32 %v581_v30, 0.0  ;;  %v573_v48 = vadd.f32 %v1224_v1, %v572_v20  ;;  %v1050_v49 = vpop.f32.mrb[14].mxu1  ;;  %v594_v54 = vadd.f32 %v1049_v40, %v1224_v1 }
 0x1e0   : > { %v782_v51 = vrot.slane %v781_v42, 2  ;;  %v816_v52 = vmax.f32 %v814_v39, %v815_v43  ;;  %v736_v53 = vsel %vm720_vm0, %v608_v44, -1e+30  ;;  %v588_v55 = vpop.f32.mrb[15].mxu1  ;;  %vm884_vm9 = vcmask 1047559  }
 0x1e1   : > { %v879_v56 = vsel %vm878_vm5, %v778_v63, %v877_v38  ;;  %v800_v57 = vsel %vm478_vm3, %v736_v53, -inf  ;;  %v739_v59 = vsel %vm723_vm1, %v611_v47, -1e+30  ;;  %v792_v60 = vmax.f32 %v790_v27, %v791_v41 }
 0x1e2   : > { %v783_v2 = vmax.f32 %v781_v42, %v782_v51  ;;  %v801_v3 = vrot.slane %v800_v57, 4  ;;  %v821_v58 = vsel %vm478_vm3, %v739_v59, -inf  ;;  %v609_v6 = vmax.f32 %v573_v48, 0.0 }
 0x1e3   : > { %v822_v4 = vrot.slane %v821_v58, 4  ;;  %v614_v7 = vmax.f32 %v594_v54, 0.0  ;;  %v586_v8 = vadd.f32 %v1224_v1, %v585_v45  ;;  %v798_v9 = vrot.slane %v797_v46, 1 }
 0x1e4   : > { %v784_v10 = vrot.slane %v783_v2, 1  ;;  %v817_v11 = vrot.slane %v816_v52, 2  ;;  %v802_v62 = vmax.f32 %v800_v57, %v801_v3  ;;  %v737_v5 = vsel %vm721_vm2, %v609_v6, -1e+30 }
 0x1e5   : > { %v823_v12 = vmax.f32 %v821_v58, %v822_v4  ;;  %v742_v13 = vsel %vm726_vm4, %v614_v7, -1e+30  ;;  %v612_v14 = vmax.f32 %v586_v8, 0.0  ;;  %v807_v17 = vsel %vm478_vm3, %v737_v5, -inf }
 0x1e6   : > { %v785_v15 = vmax.f32 %v783_v2, %v784_v10  ;;  %v803_v16 = vrot.slane %v802_v62, 2  ;;  %v597_v18 = vadd.f32 %v1050_v49, %v1224_v1  ;;  %v808_v20 = vrot.slane %v807_v17, 4 }
 0x1e7   : > { %v824_v19 = vrot.slane %v823_v12, 2  ;;  %v842_v23 = vsel %vm478_vm3, %v742_v13, -inf  ;;  %v740_v24 = vsel %vm724_vm7, %v612_v14, -1e+30  ;;  %v799_v25 = vmax.f32 %v797_v46, %v798_v9 }
 0x1e8   : > { %v881_v61 = vsel %vm880_vm6, %v785_v15, %v879_v56  ;;  %v843_v21 = vrot.slane %v842_v23, 4  ;;  %v804_v28 = vmax.f32 %v802_v62, %v803_v16  ;;  %v809_v29 = vmax.f32 %v807_v17, %v808_v20 }
 0x1e9   : > { %v883_v27 = vsel %vm882_vm8, %v792_v60, %v881_v61  ;;  %v828_v30 = vsel %vm478_vm3, %v740_v24, -inf  ;;  %v818_v31 = vmax.f32 %v816_v52, %v817_v11  ;;  %v825_v33 = vmax.f32 %v823_v12, %v824_v19 }
 0x1ea   : > { %v885_v22 = vsel %vm884_vm9, %v799_v25, %v883_v27  ;;  %v829_v32 = vrot.slane %v828_v30, 4  ;;  %v810_v34 = vrot.slane %v809_v29, 2  ;;  %v615_v35 = vmax.f32 %v597_v18, 0.0 }
 0x1eb   : > { %895 = vst.msk [vmem:[%s1306_s19] sm:$0xff] %vm478_vm3, %v885_v22  ;;  %v589_v36 = vadd.f32 %v1224_v1, %v588_v55  ;;  %vm727_vm10 = vcmp.eq.s32.totalorder %v711_v26, 1  ;;  %v844_v0 = vmax.f32 %v842_v23, %v843_v21  ;;  %v805_v38 = vrot.slane %v804_v28, 1 }
 0x1ec   : > { %v830_v37 = vmax.f32 %v828_v30, %v829_v32  ;;  %v811_v39 = vmax.f32 %v809_v29, %v810_v34  ;;  %v743_v40 = vsel %vm727_vm10, %v615_v35, -1e+30  ;;  %vm725_vm12 = vcmp.eq.s32.totalorder %v1246_v50, 1 }
 0x1ed   : > { %v613_v41 = vmax.f32 %v589_v36, 0.0  ;;  %v819_v42 = vrot.slane %v818_v31, 1  ;;  %v849_v44 = vsel %vm478_vm3, %v743_v40, -inf  ;;  %v826_v45 = vrot.slane %v825_v33, 1 }
 0x1ee   : > { %v831_v43 = vrot.slane %v830_v37, 2  ;;  %v812_v63 = vrot.slane %v811_v39, 1  ;;  %v850_v46 = vrot.slane %v849_v44, 4  ;;  %v845_v48 = vrot.slane %v844_v0, 2 }
 0x1ef   : > { %v741_v47 = vsel %vm725_vm12, %v613_v41, -1e+30  ;;  %v806_v51 = vmax.f32 %v804_v28, %v805_v38  ;;  %v820_v55 = vmax.f32 %v818_v31, %v819_v42  ;;  %v827_v57 = vmax.f32 %v825_v33, %v826_v45 }
 0x1f0   : > { %v832_v49 = vmax.f32 %v830_v37, %v831_v43  ;;  %v835_v1 = vsel %vm478_vm3, %v741_v47, -inf  ;;  %v813_v52 = vmax.f32 %v811_v39, %v812_v63  ;;  %v851_v53 = vmax.f32 %v849_v44, %v850_v46 }
 0x1f1   : > { %v836_v54 = vrot.slane %v835_v1, 4  ;;  %v846_v3 = vmax.f32 %v844_v0, %v845_v48 }
 0x1f2   : > { %v833_v56 = vrot.slane %v832_v49, 1  ;;  %v886_v50 = vsel %vm872_vm11, %v813_v52, %v806_v51  ;;  %v852_v59 = vrot.slane %v851_v53, 2 }
 0x1f3   : > { %v837_v60 = vmax.f32 %v835_v1, %v836_v54  ;;  %v887_v2 = vsel %vm874_vm13, %v820_v55, %v886_v50  ;;  %v847_v10 = vrot.slane %v846_v3, 1 }
 0x1f4   : > { %v834_v58 = vmax.f32 %v832_v49, %v833_v56  ;;  %v888_v4 = vsel %vm876_vm14, %v827_v57, %v887_v2  ;;  %v853_v6 = vmax.f32 %v851_v53, %v852_v59 }
 0x1f5   : > { %v838_v7 = vrot.slane %v837_v60, 2  ;;  %v848_v5 = vmax.f32 %v846_v3, %v847_v10 }
 0x1f6   : > { %v889_v8 = vsel %vm878_vm5, %v834_v58, %v888_v4  ;;  %v854_v11 = vrot.slane %v853_v6, 1 }
 0x1f7   : > { %v839_v9 = vmax.f32 %v837_v60, %v838_v7 }
 0x1f8   : > { %v855_v13 = vmax.f32 %v853_v6, %v854_v11 }
 0x1f9   : > { %v840_v62 = vrot.slane %v839_v9, 1 }
 0x1fb   : > { %v841_v12 = vmax.f32 %v839_v9, %v840_v62 }
 0x1fd   : > { %v890_v14 = vsel %vm880_vm6, %v841_v12, %v889_v8 }
 0x1fe   : > { %v891_v15 = vsel %vm882_vm8, %v848_v5, %v890_v14 }
 0x1ff   : > { %v892_v16 = vsel %vm884_vm9, %v855_v13, %v891_v15 }
 0x200   : > { %896 = vst.msk [vmem:[%s1306_s19 + $0x8] sm:$0xff] %vm478_vm3, %v892_v16 }
 0x201 PF: > { %s16_s21 = sadd.s32 1, %s1070_s21  }
 0x202   : > { %p13_p5 = scmp.ge.s32.totalorder %s16_s21, 4  }
 0x204   :  { %15 = sbr.rel (!%p13_p5) target bundleno = 1 (0x1), region = 77 }

// kernel: neg.16
= control target key start
LH: loop header
LB: loop body
LE: loop exit
PB: predicated region body
PF: predicated region fallthrough
CT: control target
= control target key end

     0   :  { %s40_s0 = inlined_call_operand.vmem [shape: f32[2,4,8], index: 0, kind: input, shape index: {}]   ;;  %s41_s1 = inlined_call_operand.vmem [shape: f32[2,4,8], index: 1, kind: output, shape index: {}]  }
   0x1   :  { %v2_v0 = vld [vmem:[%s40_s0] sm:$0xf]  ;;  %v16_v1 = vld [vmem:[%s40_s0 + $0x4] sm:$0xf] }
   0x2   :  { %v5_v2 = vxor.u32 2147483648, %v2_v0  ;;  %v12_v3 = vxor.u32 2147483648, %v16_v1 }
   0x4   :  { %7 = vst [vmem:[%s41_s1] sm:$0xf] %v5_v2  ;;  %17 = vst [vmem:[%s41_s1 + $0x4] sm:$0xf] %v12_v3 }

// kernel: pointnet2_forward.8
= control target key start
LH: loop header
LB: loop body
LE: loop exit
PB: predicated region body
PF: predicated region fallthrough
CT: control target
= control target key end

     0   :  { %s844_s21 = smov 0   ;;  %s908_s0 = inlined_call_operand.vmem [shape: f32[16,8,19], index: 0, kind: input, shape index: {}]   ;;  %s909_s1 = inlined_call_operand.vmem [shape: f32[16,8,1], index: 1, kind: input, shape index: {}]   ;;  %s910_s2 = inlined_call_operand.vmem [shape: bf16[19,32], index: 2, kind: input, shape index: {}]   ;;  %s911_s3 = inlined_call_operand.vmem [shape: f32[1,32], index: 3, kind: input, shape index: {}]   ;;  %s912_s4 = inlined_call_operand.vmem [shape: bf16[32,32], index: 4, kind: input, shape index: {}]   ;;  %s913_s5 = inlined_call_operand.vmem [shape: f32[1,32], index: 5, kind: input, shape index: {}]   ;;  %s914_s6 = inlined_call_operand.vmem [shape: f32[16,32], index: 6, kind: output, shape index: {}]  }
   0x1 LB: > { %s850_s22 = sadd.s32 4294967295, %s805_s21   ;;  %p725_p0 = scmp.ge.s32.totalorder %s805_s21, 1  ;;  %s805_s21 = sphi %s844_s21, %s16_s21  }
   0x2   : > { %p224_p1 = scmp.lt.s32.totalorder %s805_s21, 3 }
   0x4   : > { %p225_p2 = pnand %p725_p0, %p224_p1 }
   0x5   : > { %v795_v0 = vld [vmem:[%s910_s2] sm:$0xff] (!%p225_p2)   ;;  %vm319_vm0 = vcmask (!%p225_p2), 1040384   ;;  %v796_v1 = vld [vmem:[%s910_s2 + $0x8] ss:$0 sps:$4 sm:$0x33] (!%p225_p2)   ;;  %vm320_vm1 = vcmask (!%p225_p2), 1041408  }
   0x6   : > { %228 = sbr.rel (%p225_p2) target bundleno = 490 (0x1ea), region = 44  ;;  %759 = vmatprep.subr.bf16.mxu0 (!%p225_p2), %v795_v0  ;;  %s726_s27 = sshll.u32 (!%p225_p2), %s850_s22, 3  ;;  %v807_v2 = vmov (!%p225_p2), 65535   ;;  %vm306_vm2 = vcmask (!%p225_p2), 154624   ;;  %v797_v18 = vld [vmem:[%s912_s4] sm:$0xff] (!%p225_p2)   ;;  %v798_v19 = vld [vmem:[%s912_s4 + $0x8] sm:$0xff] (!%p225_p2)  }
   0x7   : > { %760 = vmatpush3.bf16.msra.mxu0 (!%p225_p2), %v795_v0  ;;  %v321_v3 = vsel (!%p225_p2), %vm319_vm0, 4294967295, %v807_v2  ;;  %p259_p3 = scmp.lt.s32.totalorder (!%p225_p2), %s726_s27, 15  ;;  %771 = vmatprep.subr.bf16.mxu1 (!%p225_p2), %v797_v18  ;;  %v808_v20 = vmov (!%p225_p2), 0   ;;  %v731_v37 = vld [vmem:[%s911_s3] ss:$0 sm:$0xff] (!%p225_p2)  ;;  %vm426_vm11 = vcmask (!%p225_p2), 261120  }
   0x8   : > { %v322_v4 = vsel (!%p225_p2), %vm320_vm1, %v321_v3, 0  ;;  %772 = vmatpush3.bf16.msra.mxu1 (!%p225_p2), %v797_v18  ;;  %793 = vset.pattern.permute.xlu0 (!%p225_p2), %v808_v20  ;;  %p270_p4 = scmp.lt.s32.totalorder (!%p225_p2), %s850_s22, 1 }
   0x9   : > { %v324_v5 = vand.u32 (!%p225_p2), %v796_v1, %v322_v4  ;;  %773 = vmatprep.subr.bf16.mxu1 (!%p225_p2), %v798_v19  ;;  %794 = vset.pattern.permute.xlu1 (!%p225_p2), %v808_v20 }
   0xb   : > { %761 = vmatprep.subr.bf16.mxu0 (!%p225_p2), %v324_v5 }
   0xc   : > { %762 = vmatpush3.bf16.msra.mxu0 (!%p225_p2), %v324_v5  ;;  %774 = vmatpush3.bf16.msra.mxu1 (!%p225_p2), %v798_v19 }
   0xd   : > { %s916_s27 = smov (!%p259_p3, %s726_s27), 15  ;;  %s918_s22 = smov (!%p270_p4, %s850_s22), 1 }
   0xe   : > { %s727_s28 = sshll.u32 %s916_s27, 3  ;;  %s730_s19 = sshll.u32 %s918_s22, 3 }
   0xf   : > { %s262_s7 = scalar_lea.vmem %s908_s0, %s727_s28  ;;  %s268_s14 = scalar_lea.vmem %s909_s1, %s727_s28 }
  0x10   : > { %v275_v6 = vld [vmem:[%s262_s7] sm:$0xff]  ;;  %v276_v7 = vld [vmem:[%s262_s7 + $0x8] sm:$0xff]  ;;  %v277_v8 = vld [vmem:[%s262_s7 + $0x10] sm:$0xff]  ;;  %s273_s24 = scalar_lea.vmem %s914_s6, %s730_s19 }
  0x11   : > { %v287_v9 = vpack.c.bf16 %v276_v7, %v275_v6  ;;  %v278_v10 = vld [vmem:[%s262_s7 + $0x18] sm:$0xff]  ;;  %v279_v11 = vld [vmem:[%s262_s7 + $0x20] sm:$0xff]  ;;  %v280_v12 = vld [vmem:[%s262_s7 + $0x28] sm:$0xff] }
  0x12   : > { %v288_v13 = vpack.c.bf16 %v278_v10, %v277_v8  ;;  %v289_v14 = vpack.c.bf16 %v280_v12, %v279_v11  ;;  %v281_v15 = vld [vmem:[%s262_s7 + $0x30] sm:$0xff]  ;;  %v282_v16 = vld [vmem:[%s262_s7 + $0x38] sm:$0xff]  ;;  %v512_v21 = vld [vmem:[%s268_s14] sm:$0xff] }
  0x13   : > { %763 = vmatprep.mubr.msk.bf16.mxu0 %vm306_vm2, %v287_v9  ;;  %v290_v17 = vpack.c.bf16 %v282_v16, %v281_v15  ;;  %v514_v22 = vld [vmem:[%s268_s14 + $0x10] sm:$0xff]  ;;  %v513_v23 = vld [vmem:[%s268_s14 + $0x8] sm:$0xff]  ;;  %vm520_vm3 = vcmp.gt.f32.partialorder %v512_v21, 0.5  ;;  %v515_v24 = vld [vmem:[%s268_s14 + $0x18] sm:$0xff] }
  0x14   : > { %764 = vmatmul.mubr.msk.bf16.vlgmr.msra.gmra.mrb[0].mxu0 %vm306_vm2, %v288_v13  ;;  %vm522_vm4 = vcmp.gt.f32.partialorder %v514_v22, 0.5  ;;  %vm521_vm5 = vcmp.gt.f32.partialorder %v513_v23, 0.5  ;;  %v528_v25 = vsel %vm520_vm3, 1, %v808_v20  ;;  %vm523_vm6 = vcmp.gt.f32.partialorder %v515_v24, 0.5  ;;  %v516_v27 = vld [vmem:[%s268_s14 + $0x20] sm:$0xff]  ;;  %v517_v28 = vld [vmem:[%s268_s14 + $0x28] sm:$0xff] }
  0x15   : > { %767 = vmatprep.mubr.msk.bf16.mxu0 %vm306_vm2, %v289_v14  ;;  %v530_v26 = vsel %vm522_vm4, 1, %v808_v20  ;;  %537 = vperm.xlu0 %793, %v528_v25   ;;  %v529_v29 = vsel %vm521_vm5, 1, %v808_v20  ;;  %v531_v30 = vsel %vm523_vm6, 1, %v808_v20  ;;  %vm524_vm7 = vcmp.gt.f32.partialorder %v516_v27, 0.5  ;;  %v518_v31 = vld [vmem:[%s268_s14 + $0x30] sm:$0xff]  ;;  %v519_v32 = vld [vmem:[%s268_s14 + $0x38] sm:$0xff] }
  0x16   : > { %543 = vperm.xlu1 %794, %v530_v26   ;;  %vm525_vm8 = vcmp.gt.f32.partialorder %v517_v28, 0.5  ;;  %v532_v33 = vsel %vm524_vm7, 1, %v808_v20  ;;  %vm526_vm9 = vcmp.gt.f32.partialorder %v518_v31, 0.5  ;;  %vm527_vm10 = vcmp.gt.f32.partialorder %v519_v32, 0.5  ;;  %v738_v6 = vld [vmem:[%s913_s5] ss:$0 sm:$0xff] }
  0x17   : > { %v533_v34 = vsel %vm525_vm8, 1, %v808_v20  ;;  %v534_v35 = vsel %vm526_vm9, 1, %v808_v20  ;;  %v535_v36 = vsel %vm527_vm10, 1, %v808_v20  ;;  %vm640_vm4 = vcmask 1041409  }
  0x18   : > { %vm642_vm5 = vcmask 1042434   ;;  %vm644_vm6 = vcmask 1043459   ;;  %vm646_vm7 = vcmask 1044484   ;;  %vm648_vm8 = vcmask 1045509  }
  0x19   : > { %540 = vperm.xlu0 %793, %v529_v29   ;;  %vm650_vm9 = vcmask 1046534   ;;  %vm652_vm10 = vcmask 1047559  }
  0x1a   : > { %546 = vperm.xlu1 %794, %v531_v30  }
  0x1c   : > { %768 = vmatmul.mubr.msk.bf16.gmra.mrb[4].mxu0 %vm306_vm2, %v290_v17 }
  0x1d   : > { %549 = vperm.xlu0 %793, %v532_v33  }
  0x1e   : > { %552 = vperm.xlu1 %794, %v533_v34  }
  0x21   : > { %555 = vperm.xlu0 %793, %v534_v35  }
  0x22   : > { %558 = vperm.xlu1 %794, %v535_v36  }
  0x94   : > { %v538_v2 = vpop.permute.xlu0 %537 }
  0x95   : > { %v544_v3 = vpop.permute.xlu1 %543  ;;  %vm560_vm13 = vcmp.eq.s32.totalorder %v538_v2, 1 }
  0x96   : > { %vm562_vm12 = vcmp.eq.s32.totalorder %v544_v3, 1 }
  0x98   : > { %v541_v4 = vpop.permute.xlu0 %540 }
  0x99   : > { %v547_v5 = vpop.permute.xlu1 %546  ;;  %vm561_vm15 = vcmp.eq.s32.totalorder %v541_v4, 1 }
  0x9a   : > { %vm563_vm14 = vcmp.eq.s32.totalorder %v547_v5, 1 }
  0x9c   : > { %v550_v8 = vpop.permute.xlu0 %549 }
  0x9d   : > { %v886_v13 = vpop.permute.xlu1 %552  ;;  %vm564_vm0 = vcmp.eq.s32.totalorder %v550_v8, 1 }
  0x9e   : > { %vm565_vm3 = vcmp.eq.s32.totalorder %v886_v13, 1 }
  0xa0   : > { %v556_v27 = vpop.permute.xlu0 %555 }
  0xa1   : > { %v559_v35 = vpop.permute.xlu1 %558  ;;  %vm566_vm1 = vcmp.eq.s32.totalorder %v556_v27, 1 }
  0xa2   : > { %vm567_vm2 = vcmp.eq.s32.totalorder %v559_v35, 1 }
  0xe7   : > { %v765_v38 = vpop.f32.mrb[0].mxu0 }
  0xe8   : > { %v369_v39 = vadd.f32 %v765_v38, %v731_v37  ;;  %v360_v40 = vpop.f32.mrb[1].mxu0 }
  0xe9   : > { %v361_v41 = vadd.f32 %v731_v37, %v360_v40  ;;  %v766_v42 = vpop.f32.mrb[2].mxu0 }
  0xea   : > { %v372_v43 = vadd.f32 %v766_v42, %v731_v37  ;;  %v363_v44 = vpop.f32.mrb[3].mxu0  ;;  %v393_v46 = vmax.f32 %v369_v39, 0.0 }
  0xeb   : > { %v364_v45 = vadd.f32 %v731_v37, %v363_v44  ;;  %v391_v48 = vmax.f32 %v361_v41, 0.0 }
  0xec   : > { %v394_v47 = vmax.f32 %v372_v43, 0.0 }
  0xed   : > { %v392_v49 = vmax.f32 %v364_v45, 0.0 }
  0xee   : > { %v405_v50 = vpack.c.bf16 %v394_v47, %v393_v46 }
  0xef   : > { %v769_v51 = vpop.f32.mrb[4].mxu0  ;;  %v404_v52 = vpack.c.bf16 %v392_v49, %v391_v48 }
  0xf0   : > { %v385_v53 = vadd.f32 %v769_v51, %v731_v37  ;;  %v376_v54 = vpop.f32.mrb[5].mxu0 }
  0xf1   : > { %v377_v55 = vadd.f32 %v731_v37, %v376_v54  ;;  %v770_v56 = vpop.f32.mrb[6].mxu0  ;;  %775 = vmatprep.mubr.msk.bf16.mxu1 %vm426_vm11, %v404_v52 }
  0xf2   : > { %v388_v57 = vadd.f32 %v770_v56, %v731_v37  ;;  %v379_v58 = vpop.f32.mrb[7].mxu0  ;;  %776 = vmatmul.mubr.msk.bf16.vlgmr.msra.gmra.mrb[0].mxu1 %vm426_vm11, %v405_v50  ;;  %v397_v60 = vmax.f32 %v385_v53, 0.0 }
  0xf3   : > { %v380_v59 = vadd.f32 %v731_v37, %v379_v58  ;;  %v395_v62 = vmax.f32 %v377_v55, 0.0 }
  0xf4   : > { %v398_v61 = vmax.f32 %v388_v57, 0.0 }
  0xf5   : > { %v396_v63 = vmax.f32 %v380_v59, 0.0 }
  0xf6   : > { %v407_v0 = vpack.c.bf16 %v398_v61, %v397_v60 }
  0xf7   : > { %v406_v1 = vpack.c.bf16 %v396_v63, %v395_v62 }
  0xf9   : > { %779 = vmatprep.mubr.msk.bf16.mxu1 %vm426_vm11, %v406_v1 }
  0xfa   : > { %780 = vmatmul.mubr.msk.bf16.gmra.mrb[4].mxu1 %vm426_vm11, %v407_v0 }
 0x1c5   : > { %v777_v7 = vpop.f32.mrb[0].mxu1 }
 0x1c6   : > { %v482_v9 = vadd.f32 %v777_v7, %v738_v6  ;;  %v473_v10 = vpop.f32.mrb[1].mxu1 }
 0x1c7   : > { %v474_v11 = vadd.f32 %v738_v6, %v473_v10  ;;  %v778_v12 = vpop.f32.mrb[2].mxu1 }
 0x1c8   : > { %v506_v14 = vmax.f32 %v482_v9, 0.0  ;;  %v485_v15 = vadd.f32 %v778_v12, %v738_v6  ;;  %v476_v16 = vpop.f32.mrb[3].mxu1 }
 0x1c9   : > { %v504_v17 = vmax.f32 %v474_v11, 0.0  ;;  %v477_v18 = vadd.f32 %v738_v6, %v476_v16 }
 0x1ca   : > { %v570_v19 = vsel %vm562_vm12, %v506_v14, -1e+30  ;;  %v507_v20 = vmax.f32 %v485_v15, 0.0 }
 0x1cb   : > { %v590_v21 = vsel %vm426_vm11, %v570_v19, -inf  ;;  %v568_v22 = vsel %vm560_vm13, %v504_v17, -1e+30  ;;  %v505_v23 = vmax.f32 %v477_v18, 0.0 }
 0x1cc   : > { %v591_v24 = vrot.slane %v590_v21, 4  ;;  %v576_v25 = vsel %vm426_vm11, %v568_v22, -inf  ;;  %v571_v26 = vsel %vm563_vm14, %v507_v20, -1e+30 }
 0x1cd   : > { %v577_v28 = vrot.slane %v576_v25, 4  ;;  %v597_v29 = vsel %vm426_vm11, %v571_v26, -inf  ;;  %v569_v30 = vsel %vm561_vm15, %v505_v23, -1e+30  ;;  %v781_v31 = vpop.f32.mrb[4].mxu1 }
 0x1ce   : > { %v592_v32 = vmax.f32 %v590_v21, %v591_v24  ;;  %v598_v33 = vrot.slane %v597_v29, 4  ;;  %v583_v34 = vsel %vm426_vm11, %v569_v30, -inf  ;;  %v498_v36 = vadd.f32 %v781_v31, %v738_v6  ;;  %v489_v37 = vpop.f32.mrb[5].mxu1 }
 0x1cf   : > { %v578_v38 = vmax.f32 %v576_v25, %v577_v28  ;;  %v584_v39 = vrot.slane %v583_v34, 4  ;;  %v490_v40 = vadd.f32 %v738_v6, %v489_v37  ;;  %v782_v41 = vpop.f32.mrb[6].mxu1 }
 0x1d0   : > { %v593_v42 = vrot.slane %v592_v32, 2  ;;  %v599_v43 = vmax.f32 %v597_v29, %v598_v33  ;;  %v510_v44 = vmax.f32 %v498_v36, 0.0  ;;  %v501_v45 = vadd.f32 %v782_v41, %v738_v6  ;;  %v492_v46 = vpop.f32.mrb[7].mxu1 }
 0x1d1   : > { %v579_v47 = vrot.slane %v578_v38, 2  ;;  %v585_v48 = vmax.f32 %v583_v34, %v584_v39  ;;  %v508_v49 = vmax.f32 %v490_v40, 0.0  ;;  %v493_v61 = vadd.f32 %v738_v6, %v492_v46 }
 0x1d2   : > { %v594_v50 = vmax.f32 %v592_v32, %v593_v42  ;;  %v600_v51 = vrot.slane %v599_v43, 2  ;;  %v574_v52 = vsel %vm566_vm1, %v510_v44, -1e+30  ;;  %v511_v53 = vmax.f32 %v501_v45, 0.0 }
 0x1d3   : > { %v580_v54 = vmax.f32 %v578_v38, %v579_v47  ;;  %v586_v55 = vrot.slane %v585_v48, 2  ;;  %v618_v56 = vsel %vm426_vm11, %v574_v52, -inf  ;;  %v572_v57 = vsel %vm564_vm0, %v508_v49, -1e+30 }
 0x1d4   : > { %v601_v58 = vmax.f32 %v599_v43, %v600_v51  ;;  %v619_v59 = vrot.slane %v618_v56, 4  ;;  %v604_v60 = vsel %vm426_vm11, %v572_v57, -inf  ;;  %v575_v1 = vsel %vm567_vm2, %v511_v53, -1e+30 }
 0x1d5   : > { %v581_v62 = vrot.slane %v580_v54, 1  ;;  %v587_v63 = vmax.f32 %v585_v48, %v586_v55  ;;  %v605_v0 = vrot.slane %v604_v60, 4  ;;  %v595_v2 = vrot.slane %v594_v50, 1 }
 0x1d6   : > { %v602_v3 = vrot.slane %v601_v58, 1  ;;  %v625_v4 = vsel %vm426_vm11, %v575_v1, -inf  ;;  %v620_v7 = vmax.f32 %v618_v56, %v619_v59  ;;  %v509_v8 = vmax.f32 %v493_v61, 0.0 }
 0x1d7   : > { %v588_v5 = vrot.slane %v587_v63, 1  ;;  %v606_v9 = vmax.f32 %v604_v60, %v605_v0  ;;  %v626_v10 = vrot.slane %v625_v4, 4  ;;  %v582_v11 = vmax.f32 %v580_v54, %v581_v62 }
 0x1d8   : > { %v596_v15 = vmax.f32 %v594_v50, %v595_v2  ;;  %v603_v16 = vmax.f32 %v601_v58, %v602_v3  ;;  %v573_v17 = vsel %vm565_vm3, %v509_v8, -1e+30  ;;  %v621_v19 = vrot.slane %v620_v7, 2 }
 0x1d9   : > { %v589_v6 = vmax.f32 %v587_v63, %v588_v5  ;;  %v607_v12 = vrot.slane %v606_v9, 2  ;;  %v627_v14 = vmax.f32 %v625_v4, %v626_v10  ;;  %v611_v21 = vsel %vm426_vm11, %v573_v17, -inf }
 0x1da   : > { %v612_v23 = vrot.slane %v611_v21, 4  ;;  %v622_v27 = vmax.f32 %v620_v7, %v621_v19 }
 0x1db   : > { %v641_v18 = vsel %vm640_vm4, %v589_v6, %v582_v11  ;;  %v608_v20 = vmax.f32 %v606_v9, %v607_v12  ;;  %v628_v13 = vrot.slane %v627_v14, 2 }
 0x1dc   : > { %v643_v22 = vsel %vm642_vm5, %v596_v15, %v641_v18  ;;  %v613_v26 = vmax.f32 %v611_v21, %v612_v23  ;;  %v623_v33 = vrot.slane %v622_v27, 1 }
 0x1dd   : > { %v609_v24 = vrot.slane %v608_v20, 1  ;;  %v645_v25 = vsel %vm644_vm6, %v603_v16, %v643_v22  ;;  %v629_v29 = vmax.f32 %v627_v14, %v628_v13 }
 0x1de   : > { %v614_v30 = vrot.slane %v613_v26, 2  ;;  %v624_v37 = vmax.f32 %v622_v27, %v623_v33 }
 0x1df   : > { %v610_v28 = vmax.f32 %v608_v20, %v609_v24  ;;  %v630_v34 = vrot.slane %v629_v29, 1 }
 0x1e0   : > { %v615_v32 = vmax.f32 %v613_v26, %v614_v30 }
 0x1e1   : > { %v647_v31 = vsel %vm646_vm7, %v610_v28, %v645_v25  ;;  %v631_v38 = vmax.f32 %v629_v29, %v630_v34 }
 0x1e2   : > { %v616_v35 = vrot.slane %v615_v32, 1 }
 0x1e4   : > { %v617_v36 = vmax.f32 %v615_v32, %v616_v35 }
 0x1e6   : > { %v649_v39 = vsel %vm648_vm8, %v617_v36, %v647_v31 }
 0x1e7   : > { %v651_v40 = vsel %vm650_vm9, %v624_v37, %v649_v39 }
 0x1e8   : > { %v653_v41 = vsel %vm652_vm10, %v631_v38, %v651_v40 }
 0x1e9   : > { %655 = vst.msk [vmem:[%s273_s24] sm:$0xff] %vm426_vm11, %v653_v41 }
 0x1ea PF: > { %s16_s21 = sadd.s32 1, %s805_s21  }
 0x1eb   : > { %p13_p5 = scmp.ge.s32.totalorder %s16_s21, 4  }
 0x1ed   :  { %15 = sbr.rel (!%p13_p5) target bundleno = 1 (0x1), region = 77 }

// kernel: neg.18
= control target key start
LH: loop header
LB: loop body
LE: loop exit
PB: predicated region body
PF: predicated region fallthrough
CT: control target
= control target key end

     0   :  { %s40_s0 = inlined_call_operand.vmem [shape: f32[2,8,4], index: 0, kind: input, shape index: {}]   ;;  %s41_s1 = inlined_call_operand.vmem [shape: f32[2,8,4], index: 1, kind: output, shape index: {}]  }
   0x1   :  { %v2_v0 = vld [vmem:[%s40_s0] sm:$0xf]  ;;  %v16_v1 = vld [vmem:[%s40_s0 + $0x4] sm:$0xf] }
   0x2   :  { %v5_v2 = vxor.u32 2147483648, %v2_v0  ;;  %v12_v3 = vxor.u32 2147483648, %v16_v1 }
   0x4   :  { %7 = vst [vmem:[%s41_s1] sm:$0xf] %v5_v2  ;;  %17 = vst [vmem:[%s41_s1 + $0x4] sm:$0xf] %v12_v3 }

// kernel: neg.20
= control target key start
LH: loop header
LB: loop body
LE: loop exit
PB: predicated region body
PF: predicated region fallthrough
CT: control target
= control target key end

     0   :  { %s40_s0 = inlined_call_operand.vmem [shape: f32[2,16,8], index: 0, kind: input, shape index: {}]   ;;  %s41_s1 = inlined_call_operand.vmem [shape: f32[2,16,8], index: 1, kind: output, shape index: {}]  }
   0x1   :  { %v2_v0 = vld [vmem:[%s40_s0] sm:$0xff]  ;;  %v16_v1 = vld [vmem:[%s40_s0 + $0x8] sm:$0xff] }
   0x2   :  { %v5_v2 = vxor.u32 2147483648, %v2_v0  ;;  %v12_v3 = vxor.u32 2147483648, %v16_v1 }
   0x4   :  { %7 = vst [vmem:[%s41_s1] sm:$0xff] %v5_v2  ;;  %17 = vst [vmem:[%s41_s1 + $0x8] sm:$0xff] %v12_v3 }

// kernel: pointnet2_forward.9
= control target key start
LH: loop header
LB: loop body
LE: loop exit
PB: predicated region body
PF: predicated region fallthrough
CT: control target
= control target key end

     0   :  { %vm76_vm0 = vcmask 1040384   ;;  %vm77_vm1 = vcmask 1041408   ;;  %v481_v1 = vmov 65535   ;;  %vm63_vm2 = vcmask 285696   ;;  %s622_s2 = inlined_call_operand.vmem [shape: bf16[35,32], index: 2, kind: input, shape index: {}]   ;;  %s623_s0 = inlined_call_operand.vmem [shape: f32[8,8,35], index: 0, kind: input, shape index: {}]   ;;  %s624_s4 = inlined_call_operand.vmem [shape: bf16[32,64], index: 4, kind: input, shape index: {}]   ;;  %s625_s1 = inlined_call_operand.vmem [shape: f32[8,8,1], index: 1, kind: input, shape index: {}]   ;;  %s626_s3 = inlined_call_operand.vmem [shape: f32[1,32], index: 3, kind: input, shape index: {}]   ;;  %s627_s5 = inlined_call_operand.vmem [shape: f32[1,64], index: 5, kind: input, shape index: {}]   ;;  %s628_s6 = inlined_call_operand.vmem [shape: f32[8,64], index: 6, kind: output, shape index: {}]  }
   0x1   :  { %v476_v0 = vld [vmem:[%s622_s2] sm:$0xff]   ;;  %v78_v2 = vsel %vm76_vm0, 4294967295, %v481_v1  ;;  %v477_v3 = vld [vmem:[%s622_s2 + $0x8] sm:$0xff]   ;;  %v478_v5 = vld [vmem:[%s622_s2 + $0x10] ss:$0 sps:$4 sm:$0x33]  }
   0x2   :  { %v79_v4 = vsel %vm77_vm1, %v78_v2, 0  ;;  %446 = vmatprep.subr.bf16.mxu0 %v476_v0  ;;  %v24_v6 = vld [vmem:[%s623_s0] sm:$0xff]  ;;  %v25_v7 = vld [vmem:[%s623_s0 + $0x8] sm:$0xff]  ;;  %v26_v10 = vld [vmem:[%s623_s0 + $0x10] sm:$0xff]  ;;  %v482_v21 = vmov 0   ;;  %vm183_vm11 = vcmask 261120  }
   0x3   :  { %447 = vmatpush3.bf16.msra.mxu0 %v476_v0  ;;  %v81_v8 = vand.u32 %v478_v5, %v79_v4  ;;  %v38_v9 = vpack.c.bf16 %v25_v7, %v24_v6  ;;  %v27_v11 = vld [vmem:[%s623_s0 + $0x18] sm:$0xff]  ;;  %v28_v12 = vld [vmem:[%s623_s0 + $0x20] sm:$0xff]  ;;  %v29_v13 = vld [vmem:[%s623_s0 + $0x28] sm:$0xff]  ;;  %474 = vset.pattern.permute.xlu0 %v482_v21  ;;  %vm333_vm14 = vcmask 523264  }
   0x4   :  { %448 = vmatprep.subr.bf16.mxu0 %v477_v3  ;;  %v39_v14 = vpack.c.bf16 %v27_v11, %v26_v10  ;;  %v40_v15 = vpack.c.bf16 %v29_v13, %v28_v12  ;;  %v30_v16 = vld [vmem:[%s623_s0 + $0x30] sm:$0xff]  ;;  %v31_v17 = vld [vmem:[%s623_s0 + $0x38] sm:$0xff]  ;;  %v479_v19 = vld [vmem:[%s624_s4] sm:$0xff]   ;;  %475 = vset.pattern.permute.xlu1 %v482_v21 }
   0x5   :  { %452 = vmatprep.mubr.msk.bf16.mxu0 %vm63_vm2, %v38_v9  ;;  %v41_v18 = vpack.c.bf16 %v31_v17, %v30_v16  ;;  %460 = vmatprep.subr.bf16.mxu1 %v479_v19  ;;  %v480_v20 = vld [vmem:[%s624_s4 + $0x8] sm:$0xff]   ;;  %v269_v22 = vld [vmem:[%s625_s1] sm:$0xff]  ;;  %v271_v23 = vld [vmem:[%s625_s1 + $0x10] sm:$0xff] }
   0x6   :  { %461 = vmatpush3.bf16.msra.mxu1 %v479_v19  ;;  %v270_v24 = vld [vmem:[%s625_s1 + $0x8] sm:$0xff]  ;;  %vm277_vm3 = vcmp.gt.f32.partialorder %v269_v22, 0.5  ;;  %vm279_vm4 = vcmp.gt.f32.partialorder %v271_v23, 0.5  ;;  %v272_v25 = vld [vmem:[%s625_s1 + $0x18] sm:$0xff]  ;;  %v273_v28 = vld [vmem:[%s625_s1 + $0x20] sm:$0xff] }
   0x7   :  { %449 = vmatpush3.bf16.msra.mxu0 %v477_v3  ;;  %462 = vmatprep.subr.bf16.mxu1 %v480_v20  ;;  %vm278_vm5 = vcmp.gt.f32.partialorder %v270_v24, 0.5  ;;  %v285_v26 = vsel %vm277_vm3, 1, %v482_v21  ;;  %v287_v27 = vsel %vm279_vm4, 1, %v482_v21  ;;  %vm280_vm6 = vcmp.gt.f32.partialorder %v272_v25, 0.5  ;;  %v274_v29 = vld [vmem:[%s625_s1 + $0x28] sm:$0xff]  ;;  %v275_v32 = vld [vmem:[%s625_s1 + $0x30] sm:$0xff] }
   0x8   :  { %450 = vmatprep.subr.bf16.mxu0 %v81_v8  ;;  %294 = vperm.xlu0 %474, %v285_v26   ;;  %v286_v30 = vsel %vm278_vm5, 1, %v482_v21  ;;  %v288_v31 = vsel %vm280_vm6, 1, %v482_v21  ;;  %vm281_vm7 = vcmp.gt.f32.partialorder %v273_v28, 0.5  ;;  %vm282_vm8 = vcmp.gt.f32.partialorder %v274_v29, 0.5  ;;  %v276_v33 = vld [vmem:[%s625_s1 + $0x38] sm:$0xff] }
   0x9   :  { %300 = vperm.xlu1 %475, %v287_v27   ;;  %v289_v34 = vsel %vm281_vm7, 1, %v482_v21  ;;  %v290_v35 = vsel %vm282_vm8, 1, %v482_v21  ;;  %vm283_vm9 = vcmp.gt.f32.partialorder %v275_v32, 0.5  ;;  %vm284_vm10 = vcmp.gt.f32.partialorder %v276_v33, 0.5  ;;  %v418_v38 = vld [vmem:[%s626_s3] ss:$0 sm:$0xff] }
   0xa   :  { %463 = vmatpush3.bf16.msra.mxu1 %v480_v20  ;;  %v291_v36 = vsel %vm283_vm9, 1, %v482_v21  ;;  %v292_v37 = vsel %vm284_vm10, 1, %v482_v21  ;;  %v595_v7 = vld [vmem:[%s627_s5] ss:$0 sm:$0xff]  ;;  %vm398_vm5 = vcmask 1041409   ;;  %vm400_vm6 = vcmask 1042434  }
   0xb   :  { %451 = vmatpush3.bf16.msra.mxu0 %v81_v8  ;;  %vm402_vm7 = vcmask 1043459   ;;  %vm404_vm8 = vcmask 1044484   ;;  %vm406_vm9 = vcmask 1045509   ;;  %vm408_vm10 = vcmask 1046534  }
   0xc   :  { %297 = vperm.xlu0 %474, %v286_v30  }
   0xd   :  { %303 = vperm.xlu1 %475, %v288_v31  }
   0xe   :  { %453 = vmatmul.mubr.msk.bf16.vlgmr.msra.gmra.mrb[0].mxu0 %vm63_vm2, %v39_v14 }
   0xf   :  { %456 = vmatprep.mubr.msk.bf16.mxu0 %vm63_vm2, %v40_v15 }
  0x10   :  { %306 = vperm.xlu0 %474, %v289_v34  }
  0x11   :  { %309 = vperm.xlu1 %475, %v290_v35  }
  0x14   :  { %312 = vperm.xlu0 %474, %v291_v36  }
  0x15   :  { %315 = vperm.xlu1 %475, %v292_v37  }
  0x16   :  { %457 = vmatmul.mubr.msk.bf16.gmra.mrb[4].mxu0 %vm63_vm2, %v41_v18 }
  0x87   :  { %v295_v3 = vpop.permute.xlu0 %294 }
  0x88   :  { %v301_v4 = vpop.permute.xlu1 %300  ;;  %vm317_vm13 = vcmp.eq.s32.totalorder %v295_v3, 1 }
  0x89   :  { %vm319_vm12 = vcmp.eq.s32.totalorder %v301_v4, 1 }
  0x8b   :  { %v298_v5 = vpop.permute.xlu0 %297 }
  0x8c   :  { %v304_v6 = vpop.permute.xlu1 %303  ;;  %vm318_vm0 = vcmp.eq.s32.totalorder %v298_v5, 1 }
  0x8d   :  { %vm320_vm15 = vcmp.eq.s32.totalorder %v304_v6, 1 }
  0x8f   :  { %v307_v9 = vpop.permute.xlu0 %306 }
  0x90   :  { %v599_v14 = vpop.permute.xlu1 %309  ;;  %vm321_vm1 = vcmp.eq.s32.totalorder %v307_v9, 1 }
  0x91   :  { %vm322_vm4 = vcmp.eq.s32.totalorder %v599_v14, 1 }
  0x93   :  { %v313_v28 = vpop.permute.xlu0 %312 }
  0x94   :  { %v316_v36 = vpop.permute.xlu1 %315  ;;  %vm323_vm2 = vcmp.eq.s32.totalorder %v313_v28, 1 }
  0x95   :  { %vm324_vm3 = vcmp.eq.s32.totalorder %v316_v36, 1 }
  0xe1   :  { %v454_v39 = vpop.f32.mrb[0].mxu0 }
  0xe2   :  { %v126_v40 = vadd.f32 %v454_v39, %v418_v38  ;;  %v117_v41 = vpop.f32.mrb[1].mxu0 }
  0xe3   :  { %v118_v42 = vadd.f32 %v418_v38, %v117_v41  ;;  %v455_v43 = vpop.f32.mrb[2].mxu0 }
  0xe4   :  { %v129_v44 = vadd.f32 %v455_v43, %v418_v38  ;;  %v120_v45 = vpop.f32.mrb[3].mxu0  ;;  %v150_v47 = vmax.f32 %v126_v40, 0.0 }
  0xe5   :  { %v121_v46 = vadd.f32 %v418_v38, %v120_v45  ;;  %v148_v49 = vmax.f32 %v118_v42, 0.0 }
  0xe6   :  { %v151_v48 = vmax.f32 %v129_v44, 0.0 }
  0xe7   :  { %v149_v50 = vmax.f32 %v121_v46, 0.0 }
  0xe8   :  { %v162_v51 = vpack.c.bf16 %v151_v48, %v150_v47 }
  0xe9   :  { %v458_v52 = vpop.f32.mrb[4].mxu0  ;;  %v161_v53 = vpack.c.bf16 %v149_v50, %v148_v49 }
  0xea   :  { %v142_v54 = vadd.f32 %v458_v52, %v418_v38  ;;  %v133_v55 = vpop.f32.mrb[5].mxu0 }
  0xeb   :  { %v134_v56 = vadd.f32 %v418_v38, %v133_v55  ;;  %v459_v57 = vpop.f32.mrb[6].mxu0  ;;  %464 = vmatprep.mubr.msk.bf16.mxu1 %vm183_vm11, %v161_v53 }
  0xec   :  { %v145_v58 = vadd.f32 %v459_v57, %v418_v38  ;;  %v136_v59 = vpop.f32.mrb[7].mxu0  ;;  %465 = vmatmul.mubr.msk.bf16.vlgmr.msra.gmra.mrb[0].mxu1 %vm183_vm11, %v162_v51  ;;  %v154_v61 = vmax.f32 %v142_v54, 0.0 }
  0xed   :  { %v137_v60 = vadd.f32 %v418_v38, %v136_v59  ;;  %v152_v63 = vmax.f32 %v134_v56, 0.0 }
  0xee   :  { %v155_v62 = vmax.f32 %v145_v58, 0.0 }
  0xef   :  { %v153_v0 = vmax.f32 %v137_v60, 0.0 }
  0xf0   :  { %v164_v1 = vpack.c.bf16 %v155_v62, %v154_v61 }
  0xf1   :  { %v163_v2 = vpack.c.bf16 %v153_v0, %v152_v63 }
  0xf3   :  { %468 = vmatprep.mubr.msk.bf16.mxu1 %vm183_vm11, %v163_v2 }
  0xf4   :  { %469 = vmatmul.mubr.msk.bf16.gmra.mrb[4].mxu1 %vm183_vm11, %v164_v1  ;;  %vm410_vm11 = vcmask 1047559  }
 0x1bf   :  { %v466_v8 = vpop.f32.mrb[0].mxu1 }
 0x1c0   :  { %v239_v10 = vadd.f32 %v466_v8, %v595_v7  ;;  %v230_v11 = vpop.f32.mrb[1].mxu1 }
 0x1c1   :  { %v231_v12 = vadd.f32 %v595_v7, %v230_v11  ;;  %v467_v13 = vpop.f32.mrb[2].mxu1 }
 0x1c2   :  { %v263_v15 = vmax.f32 %v239_v10, 0.0  ;;  %v242_v16 = vadd.f32 %v467_v13, %v595_v7  ;;  %v233_v17 = vpop.f32.mrb[3].mxu1 }
 0x1c3   :  { %v261_v18 = vmax.f32 %v231_v12, 0.0  ;;  %v234_v19 = vadd.f32 %v595_v7, %v233_v17 }
 0x1c4   :  { %v327_v20 = vsel %vm319_vm12, %v263_v15, -1e+30  ;;  %v264_v21 = vmax.f32 %v242_v16, 0.0 }
 0x1c5   :  { %v348_v22 = vsel %vm333_vm14, %v327_v20, -inf  ;;  %v325_v23 = vsel %vm317_vm13, %v261_v18, -1e+30  ;;  %v262_v24 = vmax.f32 %v234_v19, 0.0 }
 0x1c6   :  { %v349_v25 = vrot.slane %v348_v22, 4  ;;  %v334_v26 = vsel %vm333_vm14, %v325_v23, -inf  ;;  %v328_v27 = vsel %vm320_vm15, %v264_v21, -1e+30 }
 0x1c7   :  { %v335_v29 = vrot.slane %v334_v26, 4  ;;  %v355_v30 = vsel %vm333_vm14, %v328_v27, -inf  ;;  %v326_v31 = vsel %vm318_vm0, %v262_v24, -1e+30  ;;  %v470_v32 = vpop.f32.mrb[4].mxu1 }
 0x1c8   :  { %v350_v33 = vmax.f32 %v348_v22, %v349_v25  ;;  %v356_v34 = vrot.slane %v355_v30, 4  ;;  %v341_v35 = vsel %vm333_vm14, %v326_v31, -inf  ;;  %v255_v37 = vadd.f32 %v470_v32, %v595_v7  ;;  %v246_v38 = vpop.f32.mrb[5].mxu1 }
 0x1c9   :  { %v336_v39 = vmax.f32 %v334_v26, %v335_v29  ;;  %v342_v40 = vrot.slane %v341_v35, 4  ;;  %v247_v41 = vadd.f32 %v595_v7, %v246_v38  ;;  %v471_v42 = vpop.f32.mrb[6].mxu1 }
 0x1ca   :  { %v351_v43 = vrot.slane %v350_v33, 2  ;;  %v357_v44 = vmax.f32 %v355_v30, %v356_v34  ;;  %v267_v45 = vmax.f32 %v255_v37, 0.0  ;;  %v258_v46 = vadd.f32 %v471_v42, %v595_v7  ;;  %v249_v47 = vpop.f32.mrb[7].mxu1 }
 0x1cb   :  { %v337_v48 = vrot.slane %v336_v39, 2  ;;  %v343_v49 = vmax.f32 %v341_v35, %v342_v40  ;;  %v265_v50 = vmax.f32 %v247_v41, 0.0  ;;  %v250_v62 = vadd.f32 %v595_v7, %v249_v47 }
 0x1cc   :  { %v352_v51 = vmax.f32 %v350_v33, %v351_v43  ;;  %v358_v52 = vrot.slane %v357_v44, 2  ;;  %v331_v53 = vsel %vm323_vm2, %v267_v45, -1e+30  ;;  %v268_v54 = vmax.f32 %v258_v46, 0.0 }
 0x1cd   :  { %v338_v55 = vmax.f32 %v336_v39, %v337_v48  ;;  %v344_v56 = vrot.slane %v343_v49, 2  ;;  %v376_v57 = vsel %vm333_vm14, %v331_v53, -inf  ;;  %v329_v58 = vsel %vm321_vm1, %v265_v50, -1e+30 }
 0x1ce   :  { %v359_v59 = vmax.f32 %v357_v44, %v358_v52  ;;  %v377_v60 = vrot.slane %v376_v57, 4  ;;  %v362_v61 = vsel %vm333_vm14, %v329_v58, -inf  ;;  %v332_v2 = vsel %vm324_vm3, %v268_v54, -1e+30 }
 0x1cf   :  { %v339_v63 = vrot.slane %v338_v55, 1  ;;  %v345_v0 = vmax.f32 %v343_v49, %v344_v56  ;;  %v363_v1 = vrot.slane %v362_v61, 4  ;;  %v353_v3 = vrot.slane %v352_v51, 1 }
 0x1d0   :  { %v360_v4 = vrot.slane %v359_v59, 1  ;;  %v383_v5 = vsel %vm333_vm14, %v332_v2, -inf  ;;  %v378_v8 = vmax.f32 %v376_v57, %v377_v60  ;;  %v266_v11 = vmax.f32 %v250_v62, 0.0 }
 0x1d1   :  { %v346_v6 = vrot.slane %v345_v0, 1  ;;  %v364_v10 = vmax.f32 %v362_v61, %v363_v1  ;;  %v384_v9 = vrot.slane %v383_v5, 4  ;;  %v340_v12 = vmax.f32 %v338_v55, %v339_v63 }
 0x1d2   :  { %v354_v16 = vmax.f32 %v352_v51, %v353_v3  ;;  %v361_v17 = vmax.f32 %v359_v59, %v360_v4  ;;  %v330_v18 = vsel %vm322_vm4, %v266_v11, -1e+30  ;;  %v379_v20 = vrot.slane %v378_v8, 2 }
 0x1d3   :  { %v347_v7 = vmax.f32 %v345_v0, %v346_v6  ;;  %v365_v13 = vrot.slane %v364_v10, 2  ;;  %v385_v15 = vmax.f32 %v383_v5, %v384_v9  ;;  %v369_v22 = vsel %vm333_vm14, %v330_v18, -inf }
 0x1d4   :  { %v370_v25 = vrot.slane %v369_v22, 4  ;;  %v380_v28 = vmax.f32 %v378_v8, %v379_v20 }
 0x1d5   :  { %v399_v19 = vsel %vm398_vm5, %v347_v7, %v340_v12  ;;  %v366_v21 = vmax.f32 %v364_v10, %v365_v13  ;;  %v386_v24 = vrot.slane %v385_v15, 2 }
 0x1d6   :  { %v401_v23 = vsel %vm400_vm6, %v354_v16, %v399_v19  ;;  %v371_v27 = vmax.f32 %v369_v22, %v370_v25  ;;  %v381_v34 = vrot.slane %v380_v28, 1 }
 0x1d7   :  { %v367_v14 = vrot.slane %v366_v21, 1  ;;  %v403_v26 = vsel %vm402_vm7, %v361_v17, %v401_v23  ;;  %v387_v30 = vmax.f32 %v385_v15, %v386_v24 }
 0x1d8   :  { %v372_v31 = vrot.slane %v371_v27, 2  ;;  %v382_v38 = vmax.f32 %v380_v28, %v381_v34 }
 0x1d9   :  { %v368_v29 = vmax.f32 %v366_v21, %v367_v14  ;;  %v388_v35 = vrot.slane %v387_v30, 1 }
 0x1da   :  { %v373_v33 = vmax.f32 %v371_v27, %v372_v31 }
 0x1db   :  { %v405_v32 = vsel %vm404_vm8, %v368_v29, %v403_v26  ;;  %v389_v39 = vmax.f32 %v387_v30, %v388_v35 }
 0x1dc   :  { %v374_v36 = vrot.slane %v373_v33, 1 }
 0x1de   :  { %v375_v37 = vmax.f32 %v373_v33, %v374_v36 }
 0x1e0   :  { %v407_v40 = vsel %vm406_vm9, %v375_v37, %v405_v32 }
 0x1e1   :  { %v409_v41 = vsel %vm408_vm10, %v382_v38, %v407_v40 }
 0x1e2   :  { %v411_v42 = vsel %vm410_vm11, %v389_v39, %v409_v41 }
 0x1e3   :  { %413 = vst.msk [vmem:[%s628_s6] sm:$0xff] %vm333_vm14, %v411_v42 }

// kernel: pointnet2_forward.10
= control target key start
LH: loop header
LB: loop body
LE: loop exit
PB: predicated region body
PF: predicated region fallthrough
CT: control target
= control target key end

     0   :  { %s410_s12 = smov 0   ;;  %s448_s0 = inlined_call_operand.vmem [shape: f32[16,96], index: 0, kind: input, shape index: {}]   ;;  %s449_s1 = inlined_call_operand.vmem [shape: bf16[96,32], index: 1, kind: input, shape index: {}]   ;;  %s450_s2 = inlined_call_operand.vmem [shape: f32[1,32], index: 2, kind: input, shape index: {}]   ;;  %s451_s3 = inlined_call_operand.vmem [shape: f32[16,32], index: 3, kind: output, shape index: {}]  }
   0x1 LB: > { %s324_s13 = sadd.s32 4294967295, %s386_s12   ;;  %p328_p0 = scmp.ge.s32.totalorder %s386_s12, 1  ;;  %s386_s12 = sphi %s410_s12, %s13_s12  }
   0x2   : > { %p136_p1 = scmp.lt.s32.totalorder %s386_s12, 3 }
   0x4   : > { %p137_p2 = pnand %p328_p0, %p136_p1 }
   0x5   : > { %v374_v0 = vld [vmem:[%s449_s1] sm:$0xff] (!%p137_p2)   ;;  %v388_v1 = vmov (!%p137_p2), 0.0   ;;  %v375_v2 = vld [vmem:[%s449_s1 + $0x8] sm:$0xff] (!%p137_p2)   ;;  %vm389_vm0 = vmmov (!%p137_p2), 0   ;;  %p158_p3 = scmp.lt.s32.totalorder (!%p137_p2), %s324_s13, 1  ;;  %v376_v3 = vld [vmem:[%s449_s1 + $0x10] sm:$0xff] (!%p137_p2)  }
   0x6   : > { %140 = sbr.rel (%p137_p2) target bundleno = 247 (0xf7), region = 32  ;;  %348 = vmatprep.subr.bf16.mxu0 (!%p137_p2), %v388_v1  ;;  %360 = vmatprep.mubr.msk.bf16.mxu0 (!%p137_p2), %vm389_vm0, %v388_v1  ;;  %v377_v4 = vld [vmem:[%s449_s1 + $0x18] sm:$0xff] (!%p137_p2)   ;;  %v378_v5 = vld [vmem:[%s449_s1 + $0x20] sm:$0xff] (!%p137_p2)   ;;  %v379_v6 = vld [vmem:[%s449_s1 + $0x28] sm:$0xff] (!%p137_p2)   ;;  %vm224_vm1 = vcmask (!%p137_p2), 785408   ;;  %vm269_vm2 = vcmask (!%p137_p2), 261120  }
   0x7   : > { %349 = vmatpush3.bf16.msra.mxu0 (!%p137_p2), %v374_v0  ;;  %v331_v9 = vld [vmem:[%s450_s2] ss:$0 sm:$0xff] (!%p137_p2) }
   0x8   : > { %350 = vmatprep.subr.bf16.mxu0 (!%p137_p2), %v388_v1 }
   0xb   : > { %351 = vmatpush3.bf16.msra.mxu0 (!%p137_p2), %v375_v2 }
   0xc   : > { %352 = vmatprep.subr.bf16.mxu0 (!%p137_p2), %v388_v1 }
   0xd   : > { %s453_s13 = smov (!%p158_p3, %s324_s13), 1 }
   0xe   : > { %s329_s22 = sshll.u32 %s453_s13, 3 }
   0xf   : > { %353 = vmatpush3.bf16.msra.mxu0 %v376_v3  ;;  %s161_s27 = scalar_lea.vmem %s448_s0, %s329_s22  ;;  %s165_s7 = scalar_lea.vmem %s451_s3, %s329_s22 }
  0x10   : > { %354 = vmatprep.subr.bf16.mxu0 %v388_v1  ;;  %v167_v7 = vld [vmem:[%s161_s27] sm:$0xff] }
  0x11   : > { %v181_v8 = vpack.c.bf16 %v167_v7, %v167_v7 }
  0x13   : > { %355 = vmatpush3.bf16.msra.mxu0 %v377_v4 }
  0x14   : > { %356 = vmatprep.subr.bf16.mxu0 %v388_v1 }
  0x17   : > { %357 = vmatpush3.bf16.msra.mxu0 %v378_v5 }
  0x18   : > { %358 = vmatprep.subr.bf16.mxu0 %v388_v1 }
  0x1b   : > { %359 = vmatpush3.bf16.msra.mxu0 %v379_v6 }
  0x1e   : > { %361 = vmatmul.mubr.msk.bf16.vlgmr.msra.gmra.mrb[0].mxu0 %vm224_vm1, %v181_v8 }
  0xf1   : > { %v262_v10 = vpop.f32.mrb[0].mxu0 }
  0xf2   : > { %v263_v11 = vadd.f32 %v331_v9, %v262_v10  ;;  %v362_v12 = vpop.f32.mrb[1].mxu0 }
  0xf3   : > { %v265_v13 = vpop.f32.mrb[2].mxu0 }
  0xf4   : > { %v268_v14 = vmax.f32 %v263_v11, 0.0  ;;  %v363_v15 = vpop.f32.mrb[3].mxu0 }
  0xf6   : > { %270 = vst.msk [vmem:[%s165_s7] sm:$0xff] %vm269_vm2, %v268_v14 }
  0xf7 PF: > { %s13_s12 = sadd.s32 1, %s386_s12  }
  0xf8   : > { %p10_p4 = scmp.ge.s32.totalorder %s13_s12, 4  }
  0xfa   :  { %12 = sbr.rel (!%p10_p4) target bundleno = 1 (0x1), region = 62 }

// kernel: neg.22
= control target key start
LH: loop header
LB: loop body
LE: loop exit
PB: predicated region body
PF: predicated region fallthrough
CT: control target
= control target key end

     0   :  { %s72_s0 = inlined_call_operand.vmem [shape: f32[2,32,16], index: 0, kind: input, shape index: {}]   ;;  %s73_s1 = inlined_call_operand.vmem [shape: f32[2,32,16], index: 1, kind: output, shape index: {}]  }
   0x1   :  { %v2_v0 = vld [vmem:[%s72_s0] sm:$0xff]  ;;  %v32_v1 = vld [vmem:[%s72_s0 + $0x10] sm:$0xff]  ;;  %v34_v2 = vld [vmem:[%s72_s0 + $0x8] sm:$0xff] }
   0x2   :  { %v5_v3 = vxor.u32 2147483648, %v2_v0  ;;  %v12_v4 = vxor.u32 2147483648, %v32_v1  ;;  %v20_v5 = vxor.u32 2147483648, %v34_v2  ;;  %v36_v6 = vld [vmem:[%s72_s0 + $0x18] sm:$0xff] }
   0x3   :  { %v28_v7 = vxor.u32 2147483648, %v36_v6 }
   0x4   :  { %7 = vst [vmem:[%s73_s1] sm:$0xff] %v5_v3  ;;  %33 = vst [vmem:[%s73_s1 + $0x10] sm:$0xff] %v12_v4 }
   0x5   :  { %35 = vst [vmem:[%s73_s1 + $0x8] sm:$0xff] %v20_v5  ;;  %37 = vst [vmem:[%s73_s1 + $0x18] sm:$0xff] %v28_v7 }

// kernel: pointnet2_forward.11
= control target key start
LH: loop header
LB: loop body
LE: loop exit
PB: predicated region body
PF: predicated region fallthrough
CT: control target
= control target key end

     0   :  { %s388_s12 = smov 0   ;;  %s417_s0 = inlined_call_operand.vmem [shape: f32[32,48], index: 0, kind: input, shape index: {}]   ;;  %s418_s1 = inlined_call_operand.vmem [shape: bf16[48,32], index: 1, kind: input, shape index: {}]   ;;  %s419_s2 = inlined_call_operand.vmem [shape: f32[1,32], index: 2, kind: input, shape index: {}]   ;;  %s420_s3 = inlined_call_operand.vmem [shape: f32[32,32], index: 3, kind: output, shape index: {}]  }
   0x1 LB: > { %s315_s13 = sadd.s32 4294967295, %s364_s12   ;;  %p319_p0 = scmp.ge.s32.totalorder %s364_s12, 1  ;;  %s364_s12 = sphi %s388_s12, %s13_s12  }
   0x2   : > { %p138_p1 = scmp.lt.s32.totalorder %s364_s12, 3 }
   0x4   : > { %p139_p2 = pnand %p319_p0, %p138_p1 }
   0x5   : > { %v355_v0 = vld [vmem:[%s418_s1] sm:$0xff] (!%p139_p2)   ;;  %v366_v1 = vmov (!%p139_p2), 0.0   ;;  %v356_v2 = vld [vmem:[%s418_s1 + $0x8] sm:$0xff] (!%p139_p2)   ;;  %vm367_vm0 = vmmov (!%p139_p2), 0   ;;  %s320_s18 = sshll.u32 (!%p139_p2), %s315_s13, 1  ;;  %v357_v3 = vld [vmem:[%s418_s1 + $0x10] sm:$0xff] (!%p139_p2)  }
   0x6   : > { %142 = sbr.rel (%p139_p2) target bundleno = 238 (0xee), region = 32  ;;  %335 = vmatprep.subr.bf16.mxu0 (!%p139_p2), %v366_v1  ;;  %341 = vmatprep.mubr.msk.bf16.mxu0 (!%p139_p2), %vm367_vm0, %v366_v1  ;;  %p163_p3 = scmp.lt.s32.totalorder (!%p139_p2), %s320_s18, 3  ;;  %vm209_vm1 = vcmask (!%p139_p2), 392192   ;;  %v324_v7 = vld [vmem:[%s419_s2] ss:$0 sm:$0xff] (!%p139_p2)  ;;  %vm256_vm2 = vcmask (!%p139_p2), 261120  }
   0x7   : > { %336 = vmatpush3.bf16.msra.mxu0 (!%p139_p2), %v355_v0 }
   0x8   : > { %337 = vmatprep.subr.bf16.mxu0 (!%p139_p2), %v366_v1 }
   0xb   : > { %338 = vmatpush3.bf16.msra.mxu0 (!%p139_p2), %v356_v2 }
   0xc   : > { %339 = vmatprep.subr.bf16.mxu0 (!%p139_p2), %v366_v1 }
   0xd   : > { %s422_s18 = smov (!%p163_p3, %s320_s18), 3 }
   0xe   : > { %s321_s21 = sshll.u32 %s422_s18, 3 }
   0xf   : > { %s166_s24 = scalar_lea.vmem %s417_s0, %s321_s21  ;;  %340 = vmatpush3.bf16.msra.mxu0 %v357_v3  ;;  %s172_s29 = scalar_lea.vmem %s420_s3, %s321_s21 }
  0x10   : > { %v175_v4 = vld [vmem:[%s166_s24] sm:$0xff]  ;;  %v176_v5 = vld [vmem:[%s166_s24 + $0x8] sm:$0xff] }
  0x11   : > { %v184_v6 = vpack.c.bf16 %v176_v5, %v175_v4 }
  0x13   : > { %342 = vmatmul.mubr.msk.bf16.vlgmr.msra.gmra.mrb[0].mxu0 %vm209_vm1, %v184_v6 }
  0xe6   : > { %v247_v8 = vpop.f32.mrb[0].mxu0 }
  0xe7   : > { %v248_v9 = vadd.f32 %v324_v7, %v247_v8  ;;  %v343_v10 = vpop.f32.mrb[1].mxu0 }
  0xe8   : > { %v250_v11 = vpop.f32.mrb[2].mxu0 }
  0xe9   : > { %v254_v12 = vmax.f32 %v248_v9, 0.0  ;;  %v251_v13 = vadd.f32 %v324_v7, %v250_v11  ;;  %v344_v14 = vpop.f32.mrb[3].mxu0 }
  0xeb   : > { %257 = vst.msk [vmem:[%s172_s29] sm:$0xff] %vm256_vm2, %v254_v12  ;;  %v255_v15 = vmax.f32 %v251_v13, 0.0 }
  0xed   : > { %258 = vst.msk [vmem:[%s172_s29 + $0x8] sm:$0xff] %vm256_vm2, %v255_v15 }
  0xee PF: > { %s13_s12 = sadd.s32 1, %s364_s12  }
  0xef   : > { %p10_p4 = scmp.ge.s32.totalorder %s13_s12, 4  }
  0xf1   :  { %12 = sbr.rel (!%p10_p4) target bundleno = 1 (0x1), region = 62 }

// kernel: pointnet2_forward.12
= control target key start
LH: loop header
LB: loop body
LE: loop exit
PB: predicated region body
PF: predicated region fallthrough
CT: control target
= control target key end

     0   :  { %s576_s18 = smov 0   ;;  %s627_s0 = inlined_call_operand.vmem [shape: f32[64,35], index: 0, kind: input, shape index: {}]   ;;  %s628_s1 = inlined_call_operand.vmem [shape: bf16[35,32], index: 1, kind: input, shape index: {}]   ;;  %s629_s2 = inlined_call_operand.vmem [shape: f32[1,32], index: 2, kind: input, shape index: {}]   ;;  %s630_s3 = inlined_call_operand.vmem [shape: bf16[32,32], index: 3, kind: input, shape index: {}]   ;;  %s631_s4 = inlined_call_operand.vmem [shape: f32[1,32], index: 4, kind: input, shape index: {}]   ;;  %s632_s5 = inlined_call_operand.vmem [shape: f32[64,32], index: 5, kind: output, shape index: {}]  }
   0x1 LB: > { %s474_s19 = sadd.s32 4294967295, %s543_s18   ;;  %p478_p0 = scmp.ge.s32.totalorder %s543_s18, 1  ;;  %s543_s18 = sphi %s576_s18, %s15_s18  }
   0x2   : > { %p188_p1 = scmp.lt.s32.totalorder %s543_s18, 3 }
   0x4   : > { %p189_p2 = pnand %p478_p0, %p188_p1 }
   0x5   : > { %v532_v0 = vld [vmem:[%s628_s1] sm:$0xff] (!%p189_p2)   ;;  %vm269_vm0 = vcmask (!%p189_p2), 1040384   ;;  %v533_v1 = vld [vmem:[%s628_s1 + $0x8] sm:$0xff] (!%p189_p2)   ;;  %vm270_vm1 = vcmask (!%p189_p2), 1041408   ;;  %v545_v3 = vmov (!%p189_p2), 65535   ;;  %s479_s26 = sshll.u32 (!%p189_p2), %s474_s19, 2 }
   0x6   : > { %192 = sbr.rel (%p189_p2) target bundleno = 462 (0x1ce), region = 40  ;;  %505 = vmatprep.subr.bf16.mxu0 (!%p189_p2), %v532_v0  ;;  %v534_v2 = vld [vmem:[%s628_s1 + $0x10] ss:$0 sps:$4 sm:$0x33] (!%p189_p2)   ;;  %v271_v4 = vsel (!%p189_p2), %vm269_vm0, 4294967295, %v545_v3  ;;  %p217_p3 = scmp.lt.s32.totalorder (!%p189_p2), %s479_s26, 7 }
   0x7   : > { %506 = vmatpush3.bf16.msra.mxu0 (!%p189_p2), %v532_v0  ;;  %v272_v5 = vsel (!%p189_p2), %vm270_vm1, %v271_v4, 0  ;;  %vm262_vm2 = vcmask (!%p189_p2), 285696   ;;  %v535_v13 = vld [vmem:[%s630_s3] sm:$0xff] (!%p189_p2)   ;;  %v536_v14 = vld [vmem:[%s630_s3 + $0x8] sm:$0xff] (!%p189_p2)   ;;  %vm354_vm3 = vcmask (!%p189_p2), 261120  }
   0x8   : > { %507 = vmatprep.subr.bf16.mxu0 (!%p189_p2), %v533_v1  ;;  %v274_v6 = vand.u32 (!%p189_p2), %v534_v2, %v272_v5  ;;  %515 = vmatprep.subr.bf16.mxu1 (!%p189_p2), %v535_v13  ;;  %v483_v15 = vld [vmem:[%s629_s2] ss:$0 sm:$0xff] (!%p189_p2) }
   0x9   : > { %516 = vmatpush3.bf16.msra.mxu1 (!%p189_p2), %v535_v13  ;;  %v489_v30 = vld [vmem:[%s631_s4] ss:$0 sm:$0xff] (!%p189_p2) }
   0xa   : > { %517 = vmatprep.subr.bf16.mxu1 (!%p189_p2), %v536_v14 }
   0xb   : > { %508 = vmatpush3.bf16.msra.mxu0 (!%p189_p2), %v533_v1 }
   0xc   : > { %509 = vmatprep.subr.bf16.mxu0 (!%p189_p2), %v274_v6 }
   0xd   : > { %s634_s26 = smov (!%p217_p3, %s479_s26), 7  ;;  %518 = vmatpush3.bf16.msra.mxu1 %v536_v14 }
   0xe   : > { %s480_s27 = sshll.u32 %s634_s26, 3 }
   0xf   : > { %s220_s30 = scalar_lea.vmem %s627_s0, %s480_s27  ;;  %510 = vmatpush3.bf16.msra.mxu0 %v274_v6  ;;  %s226_s16 = scalar_lea.vmem %s632_s5, %s480_s27 }
  0x10   : > { %v229_v7 = vld [vmem:[%s220_s30] sm:$0xff]  ;;  %v230_v8 = vld [vmem:[%s220_s30 + $0x8] sm:$0xff]  ;;  %v231_v9 = vld [vmem:[%s220_s30 + $0x10] sm:$0xff] }
  0x11   : > { %v239_v10 = vpack.c.bf16 %v230_v8, %v229_v7  ;;  %v232_v11 = vld [vmem:[%s220_s30 + $0x18] sm:$0xff] }
  0x12   : > { %v240_v12 = vpack.c.bf16 %v232_v11, %v231_v9 }
  0x13   : > { %511 = vmatprep.mubr.msk.bf16.mxu0 %vm262_vm2, %v239_v10 }
  0x14   : > { %512 = vmatmul.mubr.msk.bf16.vlgmr.msra.gmra.mrb[0].mxu0 %vm262_vm2, %v240_v12 }
  0xe7   : > { %v513_v16 = vpop.f32.mrb[0].mxu0 }
  0xe8   : > { %v319_v17 = vadd.f32 %v513_v16, %v483_v15  ;;  %v310_v18 = vpop.f32.mrb[1].mxu0 }
  0xe9   : > { %v311_v19 = vadd.f32 %v483_v15, %v310_v18  ;;  %v514_v20 = vpop.f32.mrb[2].mxu0 }
  0xea   : > { %v322_v21 = vadd.f32 %v514_v20, %v483_v15  ;;  %v313_v22 = vpop.f32.mrb[3].mxu0  ;;  %v327_v24 = vmax.f32 %v319_v17, 0.0 }
  0xeb   : > { %v314_v23 = vadd.f32 %v483_v15, %v313_v22  ;;  %v325_v26 = vmax.f32 %v311_v19, 0.0 }
  0xec   : > { %v328_v25 = vmax.f32 %v322_v21, 0.0 }
  0xed   : > { %v326_v27 = vmax.f32 %v314_v23, 0.0 }
  0xee   : > { %v335_v28 = vpack.c.bf16 %v328_v25, %v327_v24 }
  0xef   : > { %v334_v29 = vpack.c.bf16 %v326_v27, %v325_v26 }
  0xf1   : > { %519 = vmatprep.mubr.msk.bf16.mxu1 %vm354_vm3, %v334_v29 }
  0xf2   : > { %520 = vmatmul.mubr.msk.bf16.vlgmr.msra.gmra.mrb[0].mxu1 %vm354_vm3, %v335_v28 }
 0x1c5   : > { %v521_v31 = vpop.f32.mrb[0].mxu1 }
 0x1c6   : > { %v395_v32 = vpop.f32.mrb[1].mxu1  ;;  %v404_v35 = vadd.f32 %v521_v31, %v489_v30 }
 0x1c7   : > { %v396_v33 = vadd.f32 %v489_v30, %v395_v32  ;;  %v522_v34 = vpop.f32.mrb[2].mxu1 }
 0x1c8   : > { %v398_v36 = vpop.f32.mrb[3].mxu1  ;;  %v407_v38 = vadd.f32 %v522_v34, %v489_v30  ;;  %v412_v41 = vmax.f32 %v404_v35, 0.0 }
 0x1c9   : > { %v410_v37 = vmax.f32 %v396_v33, 0.0  ;;  %v399_v39 = vadd.f32 %v489_v30, %v398_v36 }
 0x1ca   : > { %v413_v42 = vmax.f32 %v407_v38, 0.0  ;;  %416 = vst.msk [vmem:[%s226_s16 + $0x10] sm:$0xff] %vm354_vm3, %v412_v41 }
 0x1cb   : > { %414 = vst.msk [vmem:[%s226_s16] sm:$0xff] %vm354_vm3, %v410_v37  ;;  %v411_v40 = vmax.f32 %v399_v39, 0.0 }
 0x1cc   : > { %417 = vst.msk [vmem:[%s226_s16 + $0x18] sm:$0xff] %vm354_vm3, %v413_v42 }
 0x1cd   : > { %415 = vst.msk [vmem:[%s226_s16 + $0x8] sm:$0xff] %vm354_vm3, %v411_v40 }
 0x1ce PF: > { %s15_s18 = sadd.s32 1, %s543_s18  }
 0x1cf   : > { %p12_p4 = scmp.ge.s32.totalorder %s15_s18, 4  }
 0x1d1   :  { %14 = sbr.rel (!%p12_p4) target bundleno = 1 (0x1), region = 70 }

// kernel: pointnet2_forward.13
= control target key start
LH: loop header
LB: loop body
LE: loop exit
PB: predicated region body
PF: predicated region fallthrough
CT: control target
= control target key end

     0   :  { %s553_s18 = smov 0   ;;  %s599_s0 = inlined_call_operand.vmem [shape: f32[64,32], index: 0, kind: input, shape index: {}]   ;;  %s600_s1 = inlined_call_operand.vmem [shape: bf16[32,32], index: 1, kind: input, shape index: {}]   ;;  %s601_s2 = inlined_call_operand.vmem [shape: f32[1,32], index: 2, kind: input, shape index: {}]   ;;  %s602_s3 = inlined_call_operand.vmem [shape: bf16[32,128], index: 3, kind: input, shape index: {}]   ;;  %s603_s4 = inlined_call_operand.vmem [shape: f32[1,128], index: 4, kind: input, shape index: {}]   ;;  %s604_s5 = inlined_call_operand.vmem [shape: f32[64,128], index: 5, kind: output, shape index: {}]  }
   0x1 LB: > { %s458_s19 = sadd.s32 4294967295, %s521_s18   ;;  %p462_p0 = scmp.ge.s32.totalorder %s521_s18, 1  ;;  %s521_s18 = sphi %s553_s18, %s15_s18  }
   0x2   : > { %p188_p1 = scmp.lt.s32.totalorder %s521_s18, 3 }
   0x4   : > { %p189_p2 = pnand %p462_p0, %p188_p1 }
   0x5   : > { %v511_v0 = vld [vmem:[%s600_s1] sm:$0xff] (!%p189_p2)   ;;  %s463_s22 = sshll.u32 (!%p189_p2), %s458_s19, 2  ;;  %v512_v1 = vld [vmem:[%s600_s1 + $0x8] sm:$0xff] (!%p189_p2)   ;;  %vm258_vm0 = vcmask (!%p189_p2), 261120  }
   0x6   : > { %192 = sbr.rel (%p189_p2) target bundleno = 460 (0x1cc), region = 40  ;;  %p217_p3 = scmp.lt.s32.totalorder (!%p189_p2), %s463_s22, 7  ;;  %487 = vmatprep.subr.bf16.mxu0 (!%p189_p2), %v511_v0  ;;  %v513_v8 = vld [vmem:[%s602_s3] sm:$0xff] (!%p189_p2)   ;;  %v514_v9 = vld [vmem:[%s602_s3 + $0x8] sm:$0xff] (!%p189_p2)  }
   0x7   : > { %488 = vmatpush3.bf16.msra.mxu0 (!%p189_p2), %v511_v0  ;;  %495 = vmatprep.subr.bf16.mxu1 (!%p189_p2), %v513_v8  ;;  %v467_v10 = vld [vmem:[%s601_s2] ss:$0 sm:$0xff] (!%p189_p2) }
   0x8   : > { %489 = vmatprep.subr.bf16.mxu0 (!%p189_p2), %v512_v1  ;;  %496 = vmatpush3.bf16.msra.mxu1 (!%p189_p2), %v513_v8  ;;  %v472_v25 = vld [vmem:[%s603_s4] ss:$0 sm:$0xff] (!%p189_p2) }
   0x9   : > { %497 = vmatprep.subr.bf16.mxu1 (!%p189_p2), %v514_v9 }
   0xb   : > { %490 = vmatpush3.bf16.msra.mxu0 (!%p189_p2), %v512_v1 }
   0xc   : > { %498 = vmatpush3.bf16.msra.mxu1 (!%p189_p2), %v514_v9 }
   0xd   : > { %s606_s22 = smov (!%p217_p3, %s463_s22), 7 }
   0xe   : > { %s464_s25 = sshll.u32 %s606_s22, 3 }
   0xf   : > { %s220_s28 = scalar_lea.vmem %s599_s0, %s464_s25  ;;  %s226_s14 = scalar_lea.vmem %s604_s5, %s464_s25 }
  0x10   : > { %v229_v2 = vld [vmem:[%s220_s28] sm:$0xff]  ;;  %v230_v3 = vld [vmem:[%s220_s28 + $0x8] sm:$0xff]  ;;  %v231_v4 = vld [vmem:[%s220_s28 + $0x10] sm:$0xff] }
  0x11   : > { %v238_v5 = vpack.c.bf16 %v230_v3, %v229_v2  ;;  %v232_v6 = vld [vmem:[%s220_s28 + $0x18] sm:$0xff] }
  0x12   : > { %v239_v7 = vpack.c.bf16 %v232_v6, %v231_v4 }
  0x13   : > { %491 = vmatprep.mubr.msk.bf16.mxu0 %vm258_vm0, %v238_v5 }
  0x14   : > { %492 = vmatmul.mubr.msk.bf16.vlgmr.msra.gmra.mrb[0].mxu0 %vm258_vm0, %v239_v7 }
  0xe7   : > { %v493_v11 = vpop.f32.mrb[0].mxu0 }
  0xe8   : > { %v308_v12 = vadd.f32 %v493_v11, %v467_v10  ;;  %v299_v13 = vpop.f32.mrb[1].mxu0 }
  0xe9   : > { %v300_v14 = vadd.f32 %v467_v10, %v299_v13  ;;  %v494_v15 = vpop.f32.mrb[2].mxu0 }
  0xea   : > { %v311_v16 = vadd.f32 %v494_v15, %v467_v10  ;;  %v302_v17 = vpop.f32.mrb[3].mxu0  ;;  %v316_v19 = vmax.f32 %v308_v12, 0.0 }
  0xeb   : > { %v303_v18 = vadd.f32 %v467_v10, %v302_v17  ;;  %v314_v21 = vmax.f32 %v300_v14, 0.0 }
  0xec   : > { %v317_v20 = vmax.f32 %v311_v16, 0.0 }
  0xed   : > { %v315_v22 = vmax.f32 %v303_v18, 0.0 }
  0xee   : > { %v324_v23 = vpack.c.bf16 %v317_v20, %v316_v19 }
  0xef   : > { %v323_v24 = vpack.c.bf16 %v315_v22, %v314_v21 }
  0xf1   : > { %499 = vmatprep.mubr.msk.bf16.mxu1 %vm258_vm0, %v323_v24 }
  0xf2   : > { %500 = vmatmul.mubr.msk.bf16.vlgmr.msra.gmra.mrb[0].mxu1 %vm258_vm0, %v324_v23 }
 0x1c5   : > { %v501_v26 = vpop.f32.mrb[0].mxu1 }
 0x1c6   : > { %v383_v27 = vpop.f32.mrb[1].mxu1  ;;  %v392_v32 = vadd.f32 %v501_v26, %v472_v25 }
 0x1c7   : > { %v384_v28 = vadd.f32 %v472_v25, %v383_v27  ;;  %v502_v29 = vpop.f32.mrb[2].mxu1 }
 0x1c8   : > { %v386_v30 = vpop.f32.mrb[3].mxu1  ;;  %v395_v33 = vadd.f32 %v502_v29, %v472_v25  ;;  %400 = vst [vmem:[%s226_s14 + $0x10] sm:$0xff] %v392_v32 }
 0x1c9   : > { %398 = vst [vmem:[%s226_s14] sm:$0xff] %v384_v28  ;;  %v387_v31 = vadd.f32 %v472_v25, %v386_v30 }
 0x1ca   : > { %401 = vst [vmem:[%s226_s14 + $0x18] sm:$0xff] %v395_v33 }
 0x1cb   : > { %399 = vst [vmem:[%s226_s14 + $0x8] sm:$0xff] %v387_v31 }
 0x1cc PF: > { %s15_s18 = sadd.s32 1, %s521_s18  }
 0x1cd   : > { %p12_p4 = scmp.ge.s32.totalorder %s15_s18, 4  }
 0x1cf   :  { %14 = sbr.rel (!%p12_p4) target bundleno = 1 (0x1), region = 70 }

</bundles_post_ra>
